<compile_context>
chip_gen: v6e
topology: v6e:2x2x1
jax: 0.10.0
libtpu: 0.0.40
codegen_flags: <defaults>
</compile_context>

<pallas_src>
import jax
import jax.numpy as jnp
from jax.experimental import pallas as pl
from jax.experimental.pallas import tpu as pltpu


_LANE = 128
_TILE_CAP = 2048          # biggest useful lane-tile; tiny VMEM footprint even on v7x.
_BN_FUSE_BYTES = 8 << 20  # fuse BN stats+apply when the f32 (C, L) slab is <= 8 MiB.


def _pick_tile(L, cap=_TILE_CAP):
    """Largest multiple of 128 that divides L and is <= cap; else L (one block)."""
    if L <= cap:
        return L
    t = (cap // _LANE) * _LANE
    while t >= _LANE:
        if L % t == 0:
            return t
        t -= _LANE
    return L


# --------------------------- Pallas kernels ---------------------------------

def _mm_kernel(a_ref, b_ref, o_ref):
    o_ref[...] = jnp.dot(a_ref[...], b_ref[...],
                         preferred_element_type=jnp.float32)


def _make_phase_conv_kernel(activation):
    """One output phase of the polyphase transposed conv as a single matmul.

    Grid: (phase p in 0..3, L tile).
    x_ref: (1, 4*Cin, TL) bf16 — the 4 tap-shifted inputs packed along K.
    w_ref: (1, Cout, 4*Cin) bf16 — per-phase packed sub-kernel.
    o_ref: (1, Cout, TL) f32 — lane-dense output tile.
    """
    def kernel(x_ref, w_ref, o_ref):
        r = jnp.dot(w_ref[0], x_ref[0], preferred_element_type=jnp.float32)
        if activation == "tanh":
            r = jnp.tanh(r)          # fused epilogue (EUP slot)
        o_ref[0] = r
    return kernel


def _make_bn_fused_kernel(inv_count):
    """Single-pass BatchNorm2d (training batch stats) + affine + ReLU."""
    def kernel(x_ref, g_ref, b_ref, o_ref):
        x = x_ref[...]
        mean = jnp.sum(x, axis=1, keepdims=True) * inv_count
        var = jnp.maximum(
            jnp.sum(x * x, axis=1, keepdims=True) * inv_count - mean * mean, 0.0)
        inv = jax.lax.rsqrt(var + 1e-5)
        scale = g_ref[...] * inv
        shift = b_ref[...] - mean * scale
        o_ref[...] = jnp.maximum(x * scale + shift, 0.0).astype(o_ref.dtype)
    return kernel


def _bn_stats_kernel(x_ref, sum_ref, sq_ref, acc_s, acc_q):
    i = pl.program_id(0)

    @pl.when(i == 0)
    def _():
        acc_s[...] = jnp.zeros_like(acc_s)
        acc_q[...] = jnp.zeros_like(acc_q)

    x = x_ref[...]
    acc_s[...] += jnp.sum(x, axis=1, keepdims=True)
    acc_q[...] += jnp.sum(x * x, axis=1, keepdims=True)

    @pl.when(i == pl.num_programs(0) - 1)
    def _():
        sum_ref[...] = acc_s[...]
        sq_ref[...] = acc_q[...]


def _make_bn_apply_kernel(inv_count):
    def kernel(x_ref, sum_ref, sq_ref, g_ref, b_ref, o_ref):
        mean = sum_ref[...] * inv_count
        var = jnp.maximum(sq_ref[...] * inv_count - mean * mean, 0.0)
        inv = jax.lax.rsqrt(var + 1e-5)
        scale = g_ref[...] * inv
        shift = b_ref[...] - mean * scale
        o_ref[...] = jnp.maximum(x_ref[...] * scale + shift, 0.0).astype(o_ref.dtype)
    return kernel


# ------------------------------ Layers ---------------------------------------

def conv_transpose_s1_p0_from_1x1(x, w):
    """ConvTranspose2d(k=4, s=1, p=0, bias=False) on a 1x1 spatial input.
    x: (N, Cin, 1, 1);  w: (Cin, Cout, 4, 4)  ->  (Cout, N, 4, 4) channel-major."""
    N, Cin = x.shape[0], x.shape[1]
    Cout = w.shape[1]
    a = x.reshape(N, Cin).astype(jnp.bfloat16)
    b = w.reshape(Cin, Cout * 16).astype(jnp.bfloat16)   # lane-dense output (Cout*16)
    out = pl.pallas_call(
        _mm_kernel,
        out_shape=jax.ShapeDtypeStruct((N, Cout * 16), jnp.float32),
    )(a, b)
    return jnp.transpose(out.reshape(N, Cout, 4, 4), (1, 0, 2, 3))


def conv_transpose_s2_p1_k4(x_cm, w, *, activation=None, to_nchw=False):
    """ConvTranspose2d(kernel=4, stride=2, padding=1, bias=False), polyphase.

    x_cm: (Cin, N, H, W) channel-major activation (f32 or bf16).
    w:    (Cin, Cout, 4, 4) PyTorch ConvTranspose2d weight.
    Returns (Cout, N, 2H, 2W) f32 channel-major, or NCHW if to_nchw=True.

    Math: output phase (r, s) at spatial (a, b), batch n:
      y[co, n, 2a+r, 2b+s] = sum_{ci, di, dj} x[ci, n, a+r-di, b+s-dj]
                                              * w[ci, co, 2*di+1-r, 2*dj+1-s]
    The 4 (di, dj) taps of a phase are packed along the contraction axis so
    each phase is one (Cout, 4*Cin) x (4*Cin, L) matmul.
    """
    Cin, N, H, W = x_cm.shape
    Cout = w.shape[1]
    L = N * H * W

    # Zero-padded input; per-phase tap-packed views (small, bf16; no 16x
    # zero-filled im2col of the upsampled tensor and no NCHW transposes).
    xp = jnp.pad(x_cm.astype(jnp.bfloat16), ((0, 0), (0, 0), (1, 1), (1, 1)))
    phase_views = []
    for p in range(4):
        r, s = p // 2, p % 2
        taps = []
        for t in range(4):
            di, dj = t // 2, t % 2
            i0, j0 = 1 + r - di, 1 + s - dj
            taps.append(xp[:, :, i0:i0 + H, j0:j0 + W])      # (Cin, N, H, W)
        phase_views.append(jnp.concatenate(taps, axis=0))    # (4*Cin, N, H, W)
    xs = jnp.stack(phase_views, axis=0).reshape(4, 4 * Cin, L)

    # Per-phase packed sub-kernels: wp[p, co, t*Cin + ci] = w[ci, co, 2*di+1-r, 2*dj+1-s]
    wt = jnp.transpose(w, (2, 3, 1, 0))                      # (kh, kw, Cout, Cin)
    wrows = []
    for p in range(4):
        r, s = p // 2, p % 2
        wrows.append(jnp.concatenate(
            [wt[2 * (t // 2) + 1 - r, 2 * (t % 2) + 1 - s] for t in range(4)],
            axis=1))                                         # (Cout, 4*Cin)
    wp = jnp.stack(wrows, axis=0).astype(jnp.bfloat16)       # (4, Cout, 4*Cin)

    TL = _pick_tile(L)
    out = pl.pallas_call(
        _make_phase_conv_kernel(activation),
        out_shape=jax.ShapeDtypeStruct((4, Cout, L), jnp.float32),
        grid=(4, L // TL),                                   # (phase, L tile)
        in_specs=[
            pl.BlockSpec((1, 4 * Cin, TL), lambda p, l: (p, 0, l)),
            pl.BlockSpec((1, Cout, 4 * Cin), lambda p, l: (p, 0, 0)),
        ],
        out_specs=pl.BlockSpec((1, Cout, TL), lambda p, l: (p, 0, l)),
        compiler_params=pltpu.CompilerParams(
            dimension_semantics=("parallel", "parallel")),
    )(xs, wp)

    # Interleave the 4 phases back into the spatial grid (small XLA permute).
    out = out.reshape(2, 2, Cout, N, H, W)
    if to_nchw:
        return jnp.transpose(out, (3, 2, 4, 0, 5, 1)).reshape(N, Cout, 2 * H, 2 * W)
    return jnp.transpose(out, (2, 3, 4, 0, 5, 1)).reshape(Cout, N, 2 * H, 2 * W)


def batchnorm_relu(x_cm, gamma, beta):
    """Training-mode BatchNorm2d (biased batch stats, eps=1e-5) + ReLU, fused.
    x_cm: (C, N, H, W) f32 channel-major.  Returns bf16 (C, N, H, W)."""
    C, N, H, W = x_cm.shape
    L = N * H * W
    x2 = x_cm.reshape(C, L)
    g = gamma.reshape(C, 1)
    b = beta.reshape(C, 1)

    if C * L * 4 <= _BN_FUSE_BYTES:
        # Single-pass fully fused path (always taken at DCGAN-generator sizes).
        out = pl.pallas_call(
            _make_bn_fused_kernel(1.0 / L),
            out_shape=jax.ShapeDtypeStruct((C, L), jnp.bfloat16),
        )(x2, g, b)
        return out.reshape(C, N, H, W)

    # Fallback: tiled two-pass (partial-sum stats, then normalize/affine/ReLU).
    TL = _pick_tile(L)
    grid = (L // TL,)
    s_sum, s_sq = pl.pallas_call(
        _bn_stats_kernel,
        out_shape=(jax.ShapeDtypeStruct((C, 1), jnp.float32),
                   jax.ShapeDtypeStruct((C, 1), jnp.float32)),
        grid=grid,
        in_specs=[pl.BlockSpec((C, TL), lambda i: (0, i))],
        out_specs=(pl.BlockSpec((C, 1), lambda i: (0, 0)),
                   pl.BlockSpec((C, 1), lambda i: (0, 0))),
        scratch_shapes=[pltpu.VMEM((C, 1), jnp.float32),
                        pltpu.VMEM((C, 1), jnp.float32)],
        compiler_params=pltpu.CompilerParams(
            dimension_semantics=("arbitrary",)),
    )(x2)

    out = pl.pallas_call(
        _make_bn_apply_kernel(1.0 / L),
        out_shape=jax.ShapeDtypeStruct((C, L), jnp.bfloat16),
        grid=grid,
        in_specs=[pl.BlockSpec((C, TL), lambda i: (0, i)),
                  pl.BlockSpec((C, 1), lambda i: (0, 0)),
                  pl.BlockSpec((C, 1), lambda i: (0, 0)),
                  pl.BlockSpec((C, 1), lambda i: (0, 0)),
                  pl.BlockSpec((C, 1), lambda i: (0, 0))],
        out_specs=pl.BlockSpec((C, TL), lambda i: (0, i)),
        compiler_params=pltpu.CompilerParams(
            dimension_semantics=("parallel",)),
    )(x2, s_sum, s_sq, g, b)
    return out.reshape(C, N, H, W)


# ------------------------------ Generator ------------------------------------

def init_params(key, in_features=32, base_channels=8, image_channels=1):
    chans = [in_features, base_channels * 8, base_channels * 4,
             base_channels * 2, base_channels, image_channels]
    params = {}
    keys = jax.random.split(key, 5)
    for i in range(5):
        # ConvTranspose2d weight layout: (in_channels, out_channels, kH, kW)
        params[f"w{i}"] = 0.02 * jax.random.normal(
            keys[i], (chans[i], chans[i + 1], 4, 4), jnp.float32)
    for i in range(4):
        c = chans[i + 1]
        params[f"gamma{i}"] = jnp.ones((c,), jnp.float32)   # BN default init
        params[f"beta{i}"] = jnp.zeros((c,), jnp.float32)
    return params


def generator_forward(params, x):
    # Dropout2d(p=0) layers are identity -> omitted.
    h = conv_transpose_s1_p0_from_1x1(x, params["w0"])             # (8c, N, 4, 4)
    h = batchnorm_relu(h, params["gamma0"], params["beta0"])
    h = conv_transpose_s2_p1_k4(h, params["w1"])                   # (4c, N, 8, 8)
    h = batchnorm_relu(h, params["gamma1"], params["beta1"])
    h = conv_transpose_s2_p1_k4(h, params["w2"])                   # (2c, N, 16, 16)
    h = batchnorm_relu(h, params["gamma2"], params["beta2"])
    h = conv_transpose_s2_p1_k4(h, params["w3"])                   # (c, N, 32, 32)
    h = batchnorm_relu(h, params["gamma3"], params["beta3"])
    # Final conv with Tanh fused into the matmul epilogue; emit NCHW.
    return conv_transpose_s2_p1_k4(h, params["w4"],
                                   activation="tanh", to_nchw=True)  # (N, 1, 64, 64)


# ----------------------- Pure-JAX reference (self-check) ---------------------

def _ref_forward(params, x):
    def conv_t_s2(h, w):
        N, Cin, H, W = h.shape
        Cout, K = w.shape[1], 4
        Ho, Wo = 2 * H, 2 * W
        up = jnp.zeros((N, Cin, 2 * H - 1, 2 * W - 1), h.dtype)
        up = up.at[:, :, ::2, ::2].set(h)
        up = jnp.pad(up, ((0, 0), (0, 0), (2, 2), (2, 2)))
        wf = w[:, :, ::-1, ::-1]
        out = jnp.zeros((N, Cout, Ho, Wo), jnp.float32)
        for i in range(K):
            for j in range(K):
                out = out + jnp.einsum(
                    "nchw,co->nohw", up[:, :, i:i + Ho, j:j + Wo], wf[:, :, i, j],
                    precision=jax.lax.Precision.HIGHEST)
        return out

    def bn_relu(h, g, b):
        mean = h.mean(axis=(0, 2, 3), keepdims=True)
        var = ((h - mean) ** 2).mean(axis=(0, 2, 3), keepdims=True)
        y = (h - mean) * jax.lax.rsqrt(var + 1e-5)
        y = y * g.reshape(1, -1, 1, 1) + b.reshape(1, -1, 1, 1)
        return jnp.maximum(y, 0.0)

    h = jnp.einsum("nc,cokl->nokl", x[:, :, 0, 0], params["w0"],
                   precision=jax.lax.Precision.HIGHEST)
    h = bn_relu(h, params["gamma0"], params["beta0"])
    for i in range(1, 4):
        h = bn_relu(conv_t_s2(h, params[f"w{i}"]),
                    params[f"gamma{i}"], params[f"beta{i}"])
    return jnp.tanh(conv_t_s2(h, params["w4"]))


if __name__ == "__main__":
    key = jax.random.PRNGKey(0)
    pkey, xkey = jax.random.split(key)
    in_features, base_channels, image_channels = 32, 8, 1
    params = init_params(pkey, in_features, base_channels, image_channels)
    # DCGAN generator input: latent vector as (N, in_features, 1, 1)
    x = jax.random.normal(xkey, (2, in_features, 1, 1), jnp.float32)

    fwd = jax.jit(generator_forward)
    out = jax.block_until_ready(fwd(params, x))

    assert out.shape == (2, image_channels, 64, 64)
    assert bool(jnp.all(jnp.isfinite(out)))
    # Cross-check against an f32 pure-JAX reference (bf16-MXU tolerance).
    ref = _ref_forward(params, x)
    assert float(jnp.max(jnp.abs(out - ref))) < 0.1
    print("KERNEL_OK")
</pallas_src>

<mosaic_0001>
module attributes {stable_mosaic.version = 11 : i64} {
  func.func @_mm_kernel(%arg0: memref<2x32xbf16, #tpu.memory_space<vmem>>, %arg1: memref<32x1024xbf16, #tpu.memory_space<vmem>>, %arg2: memref<2x1024xf32, #tpu.memory_space<vmem>>) attributes {dimension_semantics = [], scalar_prefetch = 0 : i64, scratch_operands = 0 : i64, tpu.core_type = #tpu.core_type<tc>} {
    %c0 = arith.constant 0 : index
    %c0_0 = arith.constant 0 : index
    %0 = vector.load %arg0[%c0, %c0_0] : memref<2x32xbf16, #tpu.memory_space<vmem>>, vector<2x32xbf16>
    %c0_1 = arith.constant 0 : index
    %c0_2 = arith.constant 0 : index
    %1 = vector.load %arg1[%c0_1, %c0_2] : memref<32x1024xbf16, #tpu.memory_space<vmem>>, vector<32x1024xbf16>
    %cst = arith.constant dense<0.000000e+00> : vector<2x1024xf32>
    %2 = tpu.matmul %0, %1, %cst {dimension_numbers = #tpu.dot_dimension_numbers<[1], [0], [0], [1], [0, 0, 1, 1], [], []>} : vector<2x32xbf16>, vector<32x1024xbf16>, vector<2x1024xf32> -> vector<2x1024xf32>
    %c0_3 = arith.constant 0 : index
    %c0_4 = arith.constant 0 : index
    %3 = vector.load %arg2[%c0_3, %c0_4] : memref<2x1024xf32, #tpu.memory_space<vmem>>, vector<2x1024xf32>
    tpu.vector_store %arg2[%c0_3, %c0_4], %2 {strides = array<i32>} : memref<2x1024xf32, #tpu.memory_space<vmem>>, vector<2x1024xf32>,
    return
  }
}

module attributes {stable_mosaic.version = 11 : i64} {
  func.func @kernel(%arg0: memref<64x32xf32, #tpu.memory_space<vmem>>, %arg1: memref<64x1xf32, #tpu.memory_space<vmem>>, %arg2: memref<64x1xf32, #tpu.memory_space<vmem>>, %arg3: memref<64x32xbf16, #tpu.memory_space<vmem>>) attributes {dimension_semantics = [], scalar_prefetch = 0 : i64, scratch_operands = 0 : i64, tpu.core_type = #tpu.core_type<tc>} {
    %c0 = arith.constant 0 : index
    %c0_0 = arith.constant 0 : index
    %0 = vector.load %arg0[%c0, %c0_0] : memref<64x32xf32, #tpu.memory_space<vmem>>, vector<64x32xf32>
    %cst = arith.constant dense<0.000000e+00> : vector<64xf32>
    %1 = vector.multi_reduction <add>, %0, %cst [1] : vector<64x32xf32> to vector<64xf32>
    %2 = vector.shape_cast %1 : vector<64xf32> to vector<64x1xf32>
    %cst_1 = arith.constant 3.125000e-02 : f32
    %3 = vector.broadcast %cst_1 : f32 to vector<64x1xf32>
    %4 = arith.mulf %2, %3 : vector<64x1xf32>
    %5 = arith.mulf %0, %0 : vector<64x32xf32>
    %cst_2 = arith.constant dense<0.000000e+00> : vector<64xf32>
    %6 = vector.multi_reduction <add>, %5, %cst_2 [1] : vector<64x32xf32> to vector<64xf32>
    %7 = vector.shape_cast %6 : vector<64xf32> to vector<64x1xf32>
    %cst_3 = arith.constant 3.125000e-02 : f32
    %8 = vector.broadcast %cst_3 : f32 to vector<64x1xf32>
    %9 = arith.mulf %7, %8 : vector<64x1xf32>
    %10 = arith.mulf %4, %4 : vector<64x1xf32>
    %11 = arith.subf %9, %10 : vector<64x1xf32>
    %cst_4 = arith.constant 0.000000e+00 : f32
    %12 = vector.broadcast %cst_4 : f32 to vector<64x1xf32>
    %13 = arith.maximumf %11, %12 : vector<64x1xf32>
    %cst_5 = arith.constant 9.99999974E-6 : f32
    %14 = vector.broadcast %cst_5 : f32 to vector<64x1xf32>
    %15 = arith.addf %13, %14 : vector<64x1xf32>
    %16 = math.rsqrt %15 : vector<64x1xf32>
    %c0_6 = arith.constant 0 : index
    %c0_7 = arith.constant 0 : index
    %17 = vector.load %arg1[%c0_6, %c0_7] : memref<64x1xf32, #tpu.memory_space<vmem>>, vector<64x1xf32>
    %18 = arith.mulf %17, %16 : vector<64x1xf32>
    %c0_8 = arith.constant 0 : index
    %c0_9 = arith.constant 0 : index
    %19 = vector.load %arg2[%c0_8, %c0_9] : memref<64x1xf32, #tpu.memory_space<vmem>>, vector<64x1xf32>
    %20 = arith.mulf %4, %18 : vector<64x1xf32>
    %21 = arith.subf %19, %20 : vector<64x1xf32>
    %22 = vector.broadcast %18 : vector<64x1xf32> to vector<64x32xf32>
    %23 = arith.mulf %0, %22 : vector<64x32xf32>
    %24 = vector.broadcast %21 : vector<64x1xf32> to vector<64x32xf32>
    %25 = arith.addf %23, %24 : vector<64x32xf32>
    %cst_10 = arith.constant 0.000000e+00 : f32
    %26 = vector.broadcast %cst_10 : f32 to vector<64x32xf32>
    %27 = arith.maximumf %25, %26 : vector<64x32xf32>
    %28 = arith.truncf %27 : vector<64x32xf32> to vector<64x32xbf16>
    %c0_11 = arith.constant 0 : index
    %c0_12 = arith.constant 0 : index
    %29 = vector.load %arg3[%c0_11, %c0_12] : memref<64x32xbf16, #tpu.memory_space<vmem>>, vector<64x32xbf16>
    tpu.vector_store %arg3[%c0_11, %c0_12], %28 {strides = array<i32>} : memref<64x32xbf16, #tpu.memory_space<vmem>>, vector<64x32xbf16>,
    return
  }
}

module attributes {stable_mosaic.version = 11 : i64} {
  func.func @kernel(%arg0: i32, %arg1: i32, %arg2: memref<1x256x32xbf16, #tpu.memory_space<vmem>>, %arg3: memref<1x32x256xbf16, #tpu.memory_space<vmem>>, %arg4: memref<1x32x32xf32, #tpu.memory_space<vmem>>) attributes {dimension_semantics = [#tpu.dimension_semantics<parallel>, #tpu.dimension_semantics<parallel>], iteration_bounds = array<i64: 4, 1>, scalar_prefetch = 0 : i64, scratch_operands = 0 : i64, tpu.core_type = #tpu.core_type<tc>, window_params = [{transform_indices = @transform_0, window_bounds = array<i64: 1, 256, 32>}, {transform_indices = @transform_1, window_bounds = array<i64: 1, 32, 256>}, {transform_indices = @transform_2, window_bounds = array<i64: 1, 32, 32>}]} {
    %c0 = arith.constant 0 : index
    %c0_0 = arith.constant 0 : index
    %c0_1 = arith.constant 0 : index
    %0 = vector.load %arg3[%c0, %c0_0, %c0_1] : memref<1x32x256xbf16, #tpu.memory_space<vmem>>, vector<1x32x256xbf16>
    %1 = vector.shape_cast %0 : vector<1x32x256xbf16> to vector<32x256xbf16>
    %c0_2 = arith.constant 0 : index
    %c0_3 = arith.constant 0 : index
    %c0_4 = arith.constant 0 : index
    %2 = vector.load %arg2[%c0_2, %c0_3, %c0_4] : memref<1x256x32xbf16, #tpu.memory_space<vmem>>, vector<1x256x32xbf16>
    %3 = vector.shape_cast %2 : vector<1x256x32xbf16> to vector<256x32xbf16>
    %cst = arith.constant dense<0.000000e+00> : vector<32x32xf32>
    %4 = tpu.matmul %1, %3, %cst {dimension_numbers = #tpu.dot_dimension_numbers<[1], [0], [0], [1], [0, 0, 1, 1], [], []>} : vector<32x256xbf16>, vector<256x32xbf16>, vector<32x32xf32> -> vector<32x32xf32>
    %c0_5 = arith.constant 0 : index
    %c0_6 = arith.constant 0 : index
    %c0_7 = arith.constant 0 : index
    %5 = vector.load %arg4[%c0_5, %c0_6, %c0_7] : memref<1x32x32xf32, #tpu.memory_space<vmem>>, vector<1x32x32xf32>
    %6 = vector.shape_cast %5 : vector<1x32x32xf32> to vector<32x32xf32>
    %7 = vector.shape_cast %4 : vector<32x32xf32> to vector<1x32x32xf32>
    tpu.vector_store %arg4[%c0_5, %c0_6, %c0_7], %7 {strides = array<i32>} : memref<1x32x32xf32, #tpu.memory_space<vmem>>, vector<1x32x32xf32>,
    return
  }
  func.func @transform_0(%arg0: i32, %arg1: i32) -> (i32, i32, i32) {
    %c0_i32 = arith.constant 0 : i32
    %c0_i32_0 = arith.constant 0 : i32
    return %arg0, %c0_i32, %arg1 : i32, i32, i32
  }
  func.func @transform_1(%arg0: i32, %arg1: i32) -> (i32, i32, i32) {
    %c0_i32 = arith.constant 0 : i32
    %c0_i32_0 = arith.constant 0 : i32
    %c0_i32_1 = arith.constant 0 : i32
    return %arg0, %c0_i32, %c0_i32_0 : i32, i32, i32
  }
  func.func @transform_2(%arg0: i32, %arg1: i32) -> (i32, i32, i32) {
    %c0_i32 = arith.constant 0 : i32
    %c0_i32_0 = arith.constant 0 : i32
    return %arg0, %c0_i32, %arg1 : i32, i32, i32
  }
}

module attributes {stable_mosaic.version = 11 : i64} {
  func.func @kernel(%arg0: memref<32x128xf32, #tpu.memory_space<vmem>>, %arg1: memref<32x1xf32, #tpu.memory_space<vmem>>, %arg2: memref<32x1xf32, #tpu.memory_space<vmem>>, %arg3: memref<32x128xbf16, #tpu.memory_space<vmem>>) attributes {dimension_semantics = [], scalar_prefetch = 0 : i64, scratch_operands = 0 : i64, tpu.core_type = #tpu.core_type<tc>} {
    %c0 = arith.constant 0 : index
    %c0_0 = arith.constant 0 : index
    %0 = vector.load %arg0[%c0, %c0_0] : memref<32x128xf32, #tpu.memory_space<vmem>>, vector<32x128xf32>
    %cst = arith.constant dense<0.000000e+00> : vector<32xf32>
    %1 = vector.multi_reduction <add>, %0, %cst [1] : vector<32x128xf32> to vector<32xf32>
    %2 = vector.shape_cast %1 : vector<32xf32> to vector<32x1xf32>
    %cst_1 = arith.constant 7.812500e-03 : f32
    %3 = vector.broadcast %cst_1 : f32 to vector<32x1xf32>
    %4 = arith.mulf %2, %3 : vector<32x1xf32>
    %5 = arith.mulf %0, %0 : vector<32x128xf32>
    %cst_2 = arith.constant dense<0.000000e+00> : vector<32xf32>
    %6 = vector.multi_reduction <add>, %5, %cst_2 [1] : vector<32x128xf32> to vector<32xf32>
    %7 = vector.shape_cast %6 : vector<32xf32> to vector<32x1xf32>
    %cst_3 = arith.constant 7.812500e-03 : f32
    %8 = vector.broadcast %cst_3 : f32 to vector<32x1xf32>
    %9 = arith.mulf %7, %8 : vector<32x1xf32>
    %10 = arith.mulf %4, %4 : vector<32x1xf32>
    %11 = arith.subf %9, %10 : vector<32x1xf32>
    %cst_4 = arith.constant 0.000000e+00 : f32
    %12 = vector.broadcast %cst_4 : f32 to vector<32x1xf32>
    %13 = arith.maximumf %11, %12 : vector<32x1xf32>
    %cst_5 = arith.constant 9.99999974E-6 : f32
    %14 = vector.broadcast %cst_5 : f32 to vector<32x1xf32>
    %15 = arith.addf %13, %14 : vector<32x1xf32>
    %16 = math.rsqrt %15 : vector<32x1xf32>
    %c0_6 = arith.constant 0 : index
    %c0_7 = arith.constant 0 : index
    %17 = vector.load %arg1[%c0_6, %c0_7] : memref<32x1xf32, #tpu.memory_space<vmem>>, vector<32x1xf32>
    %18 = arith.mulf %17, %16 : vector<32x1xf32>
    %c0_8 = arith.constant 0 : index
    %c0_9 = arith.constant 0 : index
    %19 = vector.load %arg2[%c0_8, %c0_9] : memref<32x1xf32, #tpu.memory_space<vmem>>, vector<32x1xf32>
    %20 = arith.mulf %4, %18 : vector<32x1xf32>
    %21 = arith.subf %19, %20 : vector<32x1xf32>
    %22 = vector.broadcast %18 : vector<32x1xf32> to vector<32x128xf32>
    %23 = arith.mulf %0, %22 : vector<32x128xf32>
    %24 = vector.broadcast %21 : vector<32x1xf32> to vector<32x128xf32>
    %25 = arith.addf %23, %24 : vector<32x128xf32>
    %cst_10 = arith.constant 0.000000e+00 : f32
    %26 = vector.broadcast %cst_10 : f32 to vector<32x128xf32>
    %27 = arith.maximumf %25, %26 : vector<32x128xf32>
    %28 = arith.truncf %27 : vector<32x128xf32> to vector<32x128xbf16>
    %c0_11 = arith.constant 0 : index
    %c0_12 = arith.constant 0 : index
    %29 = vector.load %arg3[%c0_11, %c0_12] : memref<32x128xbf16, #tpu.memory_space<vmem>>, vector<32x128xbf16>
    tpu.vector_store %arg3[%c0_11, %c0_12], %28 {strides = array<i32>} : memref<32x128xbf16, #tpu.memory_space<vmem>>, vector<32x128xbf16>,
    return
  }
}

module attributes {stable_mosaic.version = 11 : i64} {
  func.func @kernel(%arg0: i32, %arg1: i32, %arg2: memref<1x128x128xbf16, #tpu.memory_space<vmem>>, %arg3: memref<1x16x128xbf16, #tpu.memory_space<vmem>>, %arg4: memref<1x16x128xf32, #tpu.memory_space<vmem>>) attributes {dimension_semantics = [#tpu.dimension_semantics<parallel>, #tpu.dimension_semantics<parallel>], iteration_bounds = array<i64: 4, 1>, scalar_prefetch = 0 : i64, scratch_operands = 0 : i64, tpu.core_type = #tpu.core_type<tc>, window_params = [{transform_indices = @transform_0, window_bounds = array<i64: 1, 128, 128>}, {transform_indices = @transform_1, window_bounds = array<i64: 1, 16, 128>}, {transform_indices = @transform_2, window_bounds = array<i64: 1, 16, 128>}]} {
    %c0 = arith.constant 0 : index
    %c0_0 = arith.constant 0 : index
    %c0_1 = arith.constant 0 : index
    %0 = vector.load %arg3[%c0, %c0_0, %c0_1] : memref<1x16x128xbf16, #tpu.memory_space<vmem>>, vector<1x16x128xbf16>
    %1 = vector.shape_cast %0 : vector<1x16x128xbf16> to vector<16x128xbf16>
    %c0_2 = arith.constant 0 : index
    %c0_3 = arith.constant 0 : index
    %c0_4 = arith.constant 0 : index
    %2 = vector.load %arg2[%c0_2, %c0_3, %c0_4] : memref<1x128x128xbf16, #tpu.memory_space<vmem>>, vector<1x128x128xbf16>
    %3 = vector.shape_cast %2 : vector<1x128x128xbf16> to vector<128x128xbf16>
    %cst = arith.constant dense<0.000000e+00> : vector<16x128xf32>
    %4 = tpu.matmul %1, %3, %cst {dimension_numbers = #tpu.dot_dimension_numbers<[1], [0], [0], [1], [0, 0, 1, 1], [], []>} : vector<16x128xbf16>, vector<128x128xbf16>, vector<16x128xf32> -> vector<16x128xf32>
    %c0_5 = arith.constant 0 : index
    %c0_6 = arith.constant 0 : index
    %c0_7 = arith.constant 0 : index
    %5 = vector.load %arg4[%c0_5, %c0_6, %c0_7] : memref<1x16x128xf32, #tpu.memory_space<vmem>>, vector<1x16x128xf32>
    %6 = vector.shape_cast %5 : vector<1x16x128xf32> to vector<16x128xf32>
    %7 = vector.shape_cast %4 : vector<16x128xf32> to vector<1x16x128xf32>
    tpu.vector_store %arg4[%c0_5, %c0_6, %c0_7], %7 {strides = array<i32>} : memref<1x16x128xf32, #tpu.memory_space<vmem>>, vector<1x16x128xf32>,
    return
  }
  func.func @transform_0(%arg0: i32, %arg1: i32) -> (i32, i32, i32) {
    %c0_i32 = arith.constant 0 : i32
    %c0_i32_0 = arith.constant 0 : i32
    return %arg0, %c0_i32, %arg1 : i32, i32, i32
  }
  func.func @transform_1(%arg0: i32, %arg1: i32) -> (i32, i32, i32) {
    %c0_i32 = arith.constant 0 : i32
    %c0_i32_0 = arith.constant 0 : i32
    %c0_i32_1 = arith.constant 0 : i32
    return %arg0, %c0_i32, %c0_i32_0 : i32, i32, i32
  }
  func.func @transform_2(%arg0: i32, %arg1: i32) -> (i32, i32, i32) {
    %c0_i32 = arith.constant 0 : i32
    %c0_i32_0 = arith.constant 0 : i32
    return %arg0, %c0_i32, %arg1 : i32, i32, i32
  }
}

module attributes {stable_mosaic.version = 11 : i64} {
  func.func @kernel(%arg0: memref<16x512xf32, #tpu.memory_space<vmem>>, %arg1: memref<16x1xf32, #tpu.memory_space<vmem>>, %arg2: memref<16x1xf32, #tpu.memory_space<vmem>>, %arg3: memref<16x512xbf16, #tpu.memory_space<vmem>>) attributes {dimension_semantics = [], scalar_prefetch = 0 : i64, scratch_operands = 0 : i64, tpu.core_type = #tpu.core_type<tc>} {
    %c0 = arith.constant 0 : index
    %c0_0 = arith.constant 0 : index
    %0 = vector.load %arg0[%c0, %c0_0] : memref<16x512xf32, #tpu.memory_space<vmem>>, vector<16x512xf32>
    %cst = arith.constant dense<0.000000e+00> : vector<16xf32>
    %1 = vector.multi_reduction <add>, %0, %cst [1] : vector<16x512xf32> to vector<16xf32>
    %2 = vector.shape_cast %1 : vector<16xf32> to vector<16x1xf32>
    %cst_1 = arith.constant 0.001953125 : f32
    %3 = vector.broadcast %cst_1 : f32 to vector<16x1xf32>
    %4 = arith.mulf %2, %3 : vector<16x1xf32>
    %5 = arith.mulf %0, %0 : vector<16x512xf32>
    %cst_2 = arith.constant dense<0.000000e+00> : vector<16xf32>
    %6 = vector.multi_reduction <add>, %5, %cst_2 [1] : vector<16x512xf32> to vector<16xf32>
    %7 = vector.shape_cast %6 : vector<16xf32> to vector<16x1xf32>
    %cst_3 = arith.constant 0.001953125 : f32
    %8 = vector.broadcast %cst_3 : f32 to vector<16x1xf32>
    %9 = arith.mulf %7, %8 : vector<16x1xf32>
    %10 = arith.mulf %4, %4 : vector<16x1xf32>
    %11 = arith.subf %9, %10 : vector<16x1xf32>
    %cst_4 = arith.constant 0.000000e+00 : f32
    %12 = vector.broadcast %cst_4 : f32 to vector<16x1xf32>
    %13 = arith.maximumf %11, %12 : vector<16x1xf32>
    %cst_5 = arith.constant 9.99999974E-6 : f32
    %14 = vector.broadcast %cst_5 : f32 to vector<16x1xf32>
    %15 = arith.addf %13, %14 : vector<16x1xf32>
    %16 = math.rsqrt %15 : vector<16x1xf32>
    %c0_6 = arith.constant 0 : index
    %c0_7 = arith.constant 0 : index
    %17 = vector.load %arg1[%c0_6, %c0_7] : memref<16x1xf32, #tpu.memory_space<vmem>>, vector<16x1xf32>
    %18 = arith.mulf %17, %16 : vector<16x1xf32>
    %c0_8 = arith.constant 0 : index
    %c0_9 = arith.constant 0 : index
    %19 = vector.load %arg2[%c0_8, %c0_9] : memref<16x1xf32, #tpu.memory_space<vmem>>, vector<16x1xf32>
    %20 = arith.mulf %4, %18 : vector<16x1xf32>
    %21 = arith.subf %19, %20 : vector<16x1xf32>
    %22 = vector.broadcast %18 : vector<16x1xf32> to vector<16x512xf32>
    %23 = arith.mulf %0, %22 : vector<16x512xf32>
    %24 = vector.broadcast %21 : vector<16x1xf32> to vector<16x512xf32>
    %25 = arith.addf %23, %24 : vector<16x512xf32>
    %cst_10 = arith.constant 0.000000e+00 : f32
    %26 = vector.broadcast %cst_10 : f32 to vector<16x512xf32>
    %27 = arith.maximumf %25, %26 : vector<16x512xf32>
    %28 = arith.truncf %27 : vector<16x512xf32> to vector<16x512xbf16>
    %c0_11 = arith.constant 0 : index
    %c0_12 = arith.constant 0 : index
    %29 = vector.load %arg3[%c0_11, %c0_12] : memref<16x512xbf16, #tpu.memory_space<vmem>>, vector<16x512xbf16>
    tpu.vector_store %arg3[%c0_11, %c0_12], %28 {strides = array<i32>} : memref<16x512xbf16, #tpu.memory_space<vmem>>, vector<16x512xbf16>,
    return
  }
}

module attributes {stable_mosaic.version = 11 : i64} {
  func.func @kernel(%arg0: i32, %arg1: i32, %arg2: memref<1x64x512xbf16, #tpu.memory_space<vmem>>, %arg3: memref<1x8x64xbf16, #tpu.memory_space<vmem>>, %arg4: memref<1x8x512xf32, #tpu.memory_space<vmem>>) attributes {dimension_semantics = [#tpu.dimension_semantics<parallel>, #tpu.dimension_semantics<parallel>], iteration_bounds = array<i64: 4, 1>, scalar_prefetch = 0 : i64, scratch_operands = 0 : i64, tpu.core_type = #tpu.core_type<tc>, window_params = [{transform_indices = @transform_0, window_bounds = array<i64: 1, 64, 512>}, {transform_indices = @transform_1, window_bounds = array<i64: 1, 8, 64>}, {transform_indices = @transform_2, window_bounds = array<i64: 1, 8, 512>}]} {
    %c0 = arith.constant 0 : index
    %c0_0 = arith.constant 0 : index
    %c0_1 = arith.constant 0 : index
    %0 = vector.load %arg3[%c0, %c0_0, %c0_1] : memref<1x8x64xbf16, #tpu.memory_space<vmem>>, vector<1x8x64xbf16>
    %1 = vector.shape_cast %0 : vector<1x8x64xbf16> to vector<8x64xbf16>
    %c0_2 = arith.constant 0 : index
    %c0_3 = arith.constant 0 : index
    %c0_4 = arith.constant 0 : index
    %2 = vector.load %arg2[%c0_2, %c0_3, %c0_4] : memref<1x64x512xbf16, #tpu.memory_space<vmem>>, vector<1x64x512xbf16>
    %3 = vector.shape_cast %2 : vector<1x64x512xbf16> to vector<64x512xbf16>
    %cst = arith.constant dense<0.000000e+00> : vector<8x512xf32>
    %4 = tpu.matmul %1, %3, %cst {dimension_numbers = #tpu.dot_dimension_numbers<[1], [0], [0], [1], [0, 0, 1, 1], [], []>} : vector<8x64xbf16>, vector<64x512xbf16>, vector<8x512xf32> -> vector<8x512xf32>
    %c0_5 = arith.constant 0 : index
    %c0_6 = arith.constant 0 : index
    %c0_7 = arith.constant 0 : index
    %5 = vector.load %arg4[%c0_5, %c0_6, %c0_7] : memref<1x8x512xf32, #tpu.memory_space<vmem>>, vector<1x8x512xf32>
    %6 = vector.shape_cast %5 : vector<1x8x512xf32> to vector<8x512xf32>
    %7 = vector.shape_cast %4 : vector<8x512xf32> to vector<1x8x512xf32>
    tpu.vector_store %arg4[%c0_5, %c0_6, %c0_7], %7 {strides = array<i32>} : memref<1x8x512xf32, #tpu.memory_space<vmem>>, vector<1x8x512xf32>,
    return
  }
  func.func @transform_0(%arg0: i32, %arg1: i32) -> (i32, i32, i32) {
    %c0_i32 = arith.constant 0 : i32
    %c0_i32_0 = arith.constant 0 : i32
    return %arg0, %c0_i32, %arg1 : i32, i32, i32
  }
  func.func @transform_1(%arg0: i32, %arg1: i32) -> (i32, i32, i32) {
    %c0_i32 = arith.constant 0 : i32
    %c0_i32_0 = arith.constant 0 : i32
    %c0_i32_1 = arith.constant 0 : i32
    return %arg0, %c0_i32, %c0_i32_0 : i32, i32, i32
  }
  func.func @transform_2(%arg0: i32, %arg1: i32) -> (i32, i32, i32) {
    %c0_i32 = arith.constant 0 : i32
    %c0_i32_0 = arith.constant 0 : i32
    return %arg0, %c0_i32, %arg1 : i32, i32, i32
  }
}

module attributes {stable_mosaic.version = 11 : i64} {
  func.func @kernel(%arg0: memref<8x2048xf32, #tpu.memory_space<vmem>>, %arg1: memref<8x1xf32, #tpu.memory_space<vmem>>, %arg2: memref<8x1xf32, #tpu.memory_space<vmem>>, %arg3: memref<8x2048xbf16, #tpu.memory_space<vmem>>) attributes {dimension_semantics = [], scalar_prefetch = 0 : i64, scratch_operands = 0 : i64, tpu.core_type = #tpu.core_type<tc>} {
    %c0 = arith.constant 0 : index
    %c0_0 = arith.constant 0 : index
    %0 = vector.load %arg0[%c0, %c0_0] : memref<8x2048xf32, #tpu.memory_space<vmem>>, vector<8x2048xf32>
    %cst = arith.constant dense<0.000000e+00> : vector<8xf32>
    %1 = vector.multi_reduction <add>, %0, %cst [1] : vector<8x2048xf32> to vector<8xf32>
    %2 = vector.shape_cast %1 : vector<8xf32> to vector<8x1xf32>
    %cst_1 = arith.constant 4.8828125E-4 : f32
    %3 = vector.broadcast %cst_1 : f32 to vector<8x1xf32>
    %4 = arith.mulf %2, %3 : vector<8x1xf32>
    %5 = arith.mulf %0, %0 : vector<8x2048xf32>
    %cst_2 = arith.constant dense<0.000000e+00> : vector<8xf32>
    %6 = vector.multi_reduction <add>, %5, %cst_2 [1] : vector<8x2048xf32> to vector<8xf32>
    %7 = vector.shape_cast %6 : vector<8xf32> to vector<8x1xf32>
    %cst_3 = arith.constant 4.8828125E-4 : f32
    %8 = vector.broadcast %cst_3 : f32 to vector<8x1xf32>
    %9 = arith.mulf %7, %8 : vector<8x1xf32>
    %10 = arith.mulf %4, %4 : vector<8x1xf32>
    %11 = arith.subf %9, %10 : vector<8x1xf32>
    %cst_4 = arith.constant 0.000000e+00 : f32
    %12 = vector.broadcast %cst_4 : f32 to vector<8x1xf32>
    %13 = arith.maximumf %11, %12 : vector<8x1xf32>
    %cst_5 = arith.constant 9.99999974E-6 : f32
    %14 = vector.broadcast %cst_5 : f32 to vector<8x1xf32>
    %15 = arith.addf %13, %14 : vector<8x1xf32>
    %16 = math.rsqrt %15 : vector<8x1xf32>
    %c0_6 = arith.constant 0 : index
    %c0_7 = arith.constant 0 : index
    %17 = vector.load %arg1[%c0_6, %c0_7] : memref<8x1xf32, #tpu.memory_space<vmem>>, vector<8x1xf32>
    %18 = arith.mulf %17, %16 : vector<8x1xf32>
    %c0_8 = arith.constant 0 : index
    %c0_9 = arith.constant 0 : index
    %19 = vector.load %arg2[%c0_8, %c0_9] : memref<8x1xf32, #tpu.memory_space<vmem>>, vector<8x1xf32>
    %20 = arith.mulf %4, %18 : vector<8x1xf32>
    %21 = arith.subf %19, %20 : vector<8x1xf32>
    %22 = vector.broadcast %18 : vector<8x1xf32> to vector<8x2048xf32>
    %23 = arith.mulf %0, %22 : vector<8x2048xf32>
    %24 = vector.broadcast %21 : vector<8x1xf32> to vector<8x2048xf32>
    %25 = arith.addf %23, %24 : vector<8x2048xf32>
    %cst_10 = arith.constant 0.000000e+00 : f32
    %26 = vector.broadcast %cst_10 : f32 to vector<8x2048xf32>
    %27 = arith.maximumf %25, %26 : vector<8x2048xf32>
    %28 = arith.truncf %27 : vector<8x2048xf32> to vector<8x2048xbf16>
    %c0_11 = arith.constant 0 : index
    %c0_12 = arith.constant 0 : index
    %29 = vector.load %arg3[%c0_11, %c0_12] : memref<8x2048xbf16, #tpu.memory_space<vmem>>, vector<8x2048xbf16>
    tpu.vector_store %arg3[%c0_11, %c0_12], %28 {strides = array<i32>} : memref<8x2048xbf16, #tpu.memory_space<vmem>>, vector<8x2048xbf16>,
    return
  }
}

module attributes {stable_mosaic.version = 11 : i64} {
  func.func @kernel(%arg0: i32, %arg1: i32, %arg2: memref<1x32x2048xbf16, #tpu.memory_space<vmem>>, %arg3: memref<1x1x32xbf16, #tpu.memory_space<vmem>>, %arg4: memref<1x1x2048xf32, #tpu.memory_space<vmem>>) attributes {dimension_semantics = [#tpu.dimension_semantics<parallel>, #tpu.dimension_semantics<parallel>], iteration_bounds = array<i64: 4, 1>, scalar_prefetch = 0 : i64, scratch_operands = 0 : i64, tpu.core_type = #tpu.core_type<tc>, window_params = [{transform_indices = @transform_0, window_bounds = array<i64: 1, 32, 2048>}, {transform_indices = @transform_1, window_bounds = array<i64: 1, 1, 32>}, {transform_indices = @transform_2, window_bounds = array<i64: 1, 1, 2048>}]} {
    %c0 = arith.constant 0 : index
    %c0_0 = arith.constant 0 : index
    %c0_1 = arith.constant 0 : index
    %0 = vector.load %arg3[%c0, %c0_0, %c0_1] : memref<1x1x32xbf16, #tpu.memory_space<vmem>>, vector<1x1x32xbf16>
    %1 = vector.shape_cast %0 : vector<1x1x32xbf16> to vector<1x32xbf16>
    %c0_2 = arith.constant 0 : index
    %c0_3 = arith.constant 0 : index
    %c0_4 = arith.constant 0 : index
    %2 = vector.load %arg2[%c0_2, %c0_3, %c0_4] : memref<1x32x2048xbf16, #tpu.memory_space<vmem>>, vector<1x32x2048xbf16>
    %3 = vector.shape_cast %2 : vector<1x32x2048xbf16> to vector<32x2048xbf16>
    %cst = arith.constant dense<0.000000e+00> : vector<1x2048xf32>
    %4 = tpu.matmul %1, %3, %cst {dimension_numbers = #tpu.dot_dimension_numbers<[1], [0], [0], [1], [0, 0, 1, 1], [], []>} : vector<1x32xbf16>, vector<32x2048xbf16>, vector<1x2048xf32> -> vector<1x2048xf32>
    %5 = math.tanh %4 : vector<1x2048xf32>
    %c0_5 = arith.constant 0 : index
    %c0_6 = arith.constant 0 : index
    %c0_7 = arith.constant 0 : index
    %6 = vector.load %arg4[%c0_5, %c0_6, %c0_7] : memref<1x1x2048xf32, #tpu.memory_space<vmem>>, vector<1x1x2048xf32>
    %7 = vector.shape_cast %6 : vector<1x1x2048xf32> to vector<1x2048xf32>
    %8 = vector.shape_cast %5 : vector<1x2048xf32> to vector<1x1x2048xf32>
    tpu.vector_store %arg4[%c0_5, %c0_6, %c0_7], %8 {strides = array<i32>} : memref<1x1x2048xf32, #tpu.memory_space<vmem>>, vector<1x1x2048xf32>,
    return
  }
  func.func @transform_0(%arg0: i32, %arg1: i32) -> (i32, i32, i32) {
    %c0_i32 = arith.constant 0 : i32
    %c0_i32_0 = arith.constant 0 : i32
    return %arg0, %c0_i32, %arg1 : i32, i32, i32
  }
  func.func @transform_1(%arg0: i32, %arg1: i32) -> (i32, i32, i32) {
    %c0_i32 = arith.constant 0 : i32
    %c0_i32_0 = arith.constant 0 : i32
    %c0_i32_1 = arith.constant 0 : i32
    return %arg0, %c0_i32, %c0_i32_0 : i32, i32, i32
  }
  func.func @transform_2(%arg0: i32, %arg1: i32) -> (i32, i32, i32) {
    %c0_i32 = arith.constant 0 : i32
    %c0_i32_0 = arith.constant 0 : i32
    return %arg0, %c0_i32, %arg1 : i32, i32, i32
  }
}

</mosaic_0001>

<bundles_post_ra>
// kernel: generator_forward.9
= control target key start
LH: loop header
LB: loop body
LE: loop exit
PB: predicated region body
PF: predicated region fallthrough
CT: control target
= control target key end

     0   :  { %v349_v3 = vmov 0   ;;  %vm109_vm0 = vcmask 261120   ;;  %v350_v34 = vmov 1983009808   ;;  %v290_v36 = vlaneseq  ;;  %s427_s1 = inlined_call_operand.vmem [shape: bf16[32,1024], index: 1, kind: input, shape index: {}]   ;;  %s428_s0 = inlined_call_operand.vmem [shape: bf16[2,32], index: 0, kind: input, shape index: {}]   ;;  %s429_s2 = inlined_call_operand.vmem [shape: f32[2,1024], index: 2, kind: output, shape index: {}]  }
   0x1   :  { %v21_v0 = vld [vmem:[%s427_s1 + $0x40] sm:$0xff]  ;;  %v22_v2 = vld [vmem:[%s427_s1 + $0x48] sm:$0xff]  ;;  %145 = vmatprep.mubr.bf16.mxu0 %v349_v3  ;;  %186 = vmatprep.mubr.bf16.mxu1 %v349_v3  ;;  %v23_v15 = vld [vmem:[%s427_s1 + $0x50] sm:$0xff]  ;;  %v288_v35 = vunpack.c.l.s4 %v350_v34 }
   0x2   :  { %v25_v1 = vld [vmem:[%s427_s1 + $0x60] sm:$0xff]  ;;  %v26_v5 = vld [vmem:[%s427_s1 + $0x68] sm:$0xff]  ;;  %v27_v16 = vld [vmem:[%s427_s1 + $0x70] sm:$0xff]  ;;  %v291_v38 = vshrl.u32 %v290_v36, 7 }
   0x3   :  { %v336_v4 = vcombine.high %v21_v0, %v25_v1  ;;  %v335_v6 = vcombine.low %v21_v0, %v25_v1  ;;  %v13_v7 = vld [vmem:[%s427_s1] sm:$0xff]  ;;  %v338_v9 = vcombine.high %v22_v2, %v26_v5  ;;  %v337_v10 = vcombine.low %v22_v2, %v26_v5  ;;  %v14_v12 = vld [vmem:[%s427_s1 + $0x8] sm:$0xff]  ;;  %v24_v17 = vld [vmem:[%s427_s1 + $0x58] sm:$0xff] }
   0x4   :  { %v17_v8 = vld [vmem:[%s427_s1 + $0x20] sm:$0xff]  ;;  %v18_v13 = vld [vmem:[%s427_s1 + $0x28] sm:$0xff]  ;;  %v28_v19 = vld [vmem:[%s427_s1 + $0x78] sm:$0xff]  ;;  %v340_v21 = vcombine.high %v23_v15, %v27_v16  ;;  %v339_v28 = vcombine.low %v23_v15, %v27_v16  ;;  %v289_v37 = vunpack.c.0.s8 %v288_v35 }
   0x5   :  { %v328_v11 = vcombine.high %v13_v7, %v17_v8  ;;  %125 = vmatprep.subr.bf16.mxu0 %v336_v4  ;;  %v330_v14 = vcombine.high %v14_v12, %v18_v13  ;;  %166 = vmatprep.subr.bf16.mxu1 %v338_v9  ;;  %v327_v18 = vcombine.low %v13_v7, %v17_v8  ;;  %v15_v23 = vld [vmem:[%s427_s1 + $0x10] sm:$0xff]  ;;  %v16_v25 = vld [vmem:[%s427_s1 + $0x18] sm:$0xff]  ;;  %v12_v27 = vld [vmem:[%s428_s0] sm:$0x1] }
   0x6   :  { %126 = vmatpush1.bf16.msra.mxu0 %v335_v6  ;;  %167 = vmatpush1.bf16.msra.mxu1 %v337_v10  ;;  %v329_v20 = vcombine.low %v14_v12, %v18_v13  ;;  %v342_v22 = vcombine.high %v24_v17, %v28_v19  ;;  %v19_v24 = vld [vmem:[%s427_s1 + $0x30] sm:$0xff]  ;;  %v20_v26 = vld [vmem:[%s427_s1 + $0x38] sm:$0xff]  ;;  %v341_v29 = vcombine.low %v24_v17, %v28_v19 }
   0x7   :  { %127 = vmatprep.subr.bf16.mxu0 %v328_v11  ;;  %168 = vmatprep.subr.bf16.mxu1 %v330_v14  ;;  %v332_v30 = vcombine.high %v15_v23, %v19_v24  ;;  %v334_v31 = vcombine.high %v16_v25, %v20_v26  ;;  %v331_v32 = vcombine.low %v15_v23, %v19_v24 }
   0x8   :  { %v333_v33 = vcombine.low %v16_v25, %v20_v26  ;;  %v292_v41 = vsub.s32 %v289_v37, %v291_v38 }
   0xa   :  { %128 = vmatpush1.bf16.msra.mxu0 %v327_v18  ;;  %169 = vmatpush1.bf16.msra.mxu1 %v329_v20 }
   0xb   :  { %207 = vmatprep.subr.bf16.mxu0 %v340_v21  ;;  %248 = vmatprep.subr.bf16.mxu1 %v342_v22 }
   0xd   :  { %343 = vmatmul.mubr.msk.bf16.vlgmr.msra.gmra.mxu0 %vm109_vm0, %v12_v27  ;;  %344 = vmatmul.mubr.msk.bf16.vlgmr.msra.gmra.mxu1 %vm109_vm0, %v12_v27 }
   0xe   :  { %208 = vmatpush1.bf16.msra.mxu0 %v339_v28  ;;  %249 = vmatpush1.bf16.msra.mxu1 %v341_v29 }
   0xf   :  { %209 = vmatprep.subr.bf16.mxu0 %v332_v30  ;;  %250 = vmatprep.subr.bf16.mxu1 %v334_v31 }
  0x10   :  { %227 = vmatprep.mubr.bf16.mxu0 %v349_v3  ;;  %268 = vmatprep.mubr.bf16.mxu1 %v349_v3 }
  0x12   :  { %210 = vmatpush1.bf16.msra.mxu0 %v331_v32  ;;  %251 = vmatpush1.bf16.msra.mxu1 %v333_v33 }
  0x15   :  { %345 = vmatmul.mubr.msk.bf16.vlgmr.msra.gmra.mxu0 %vm109_vm0, %v12_v27  ;;  %346 = vmatmul.mubr.msk.bf16.vlgmr.msra.gmra.mxu1 %vm109_vm0, %v12_v27 }
  0xcd   :  { %v147_v39 = vpop.f32.mrf.mxu0  ;;  %v188_v40 = vpop.f32.mrf.mxu1 }
  0xcf   :  { %v149_v42 = vpop.f32.mrf.mxu0  ;;  %v190_v44 = vpop.f32.mrf.mxu1 }
  0xd0   :  { %v285_v43 = vcombine.low %v147_v39, %v149_v42  ;;  %v286_v45 = vcombine.low %v188_v40, %v190_v44 }
  0xd1   :  { %v151_v46 = vpop.f32.mrf.mxu0  ;;  %v192_v48 = vpop.f32.mrf.mxu1 }
  0xd2   :  { %v293_v47 = vrot.slane %v285_v43, %v292_v41  ;;  %v300_v49 = vrot.slane %v286_v45, %v292_v41 }
  0xd3   :  { %v152_v50 = vpop.f32.mrf.mxu0  ;;  %v193_v51 = vpop.f32.mrf.mxu1 }
  0xd4   :  { %v301_v52 = vcombine.low %v293_v47, %v300_v49 }
  0xd5   :  { %v229_v53 = vpop.f32.mrf.mxu0  ;;  %v270_v54 = vpop.f32.mrf.mxu1 }
  0xd6   :  { %321 = vst [vmem:[%s429_s2] sm:$0xff] %v301_v52 }
  0xd7   :  { %v231_v55 = vpop.f32.mrf.mxu0  ;;  %v272_v57 = vpop.f32.mrf.mxu1 }
  0xd8   :  { %v302_v56 = vcombine.low %v229_v53, %v231_v55  ;;  %v303_v58 = vcombine.low %v270_v54, %v272_v57 }
  0xd9   :  { %v233_v59 = vpop.f32.mrf.mxu0  ;;  %v274_v61 = vpop.f32.mrf.mxu1 }
  0xda   :  { %v310_v60 = vrot.slane %v302_v56, %v292_v41  ;;  %v317_v62 = vrot.slane %v303_v58, %v292_v41 }
  0xdb   :  { %v234_v63 = vpop.f32.mrf.mxu0  ;;  %v275_v0 = vpop.f32.mrf.mxu1 }
  0xdc   :  { %v318_v1 = vcombine.low %v310_v60, %v317_v62 }
  0xde   :  { %322 = vst [vmem:[%s429_s2 + $0x8] sm:$0xff] %v318_v1 }

// kernel: generator_forward.10
= control target key start
LH: loop header
LB: loop body
LE: loop exit
PB: predicated region body
PF: predicated region fallthrough
CT: control target
= control target key end

     0   :  { %vm22_vm0 = vcmask 261120   ;;  %v359_v32 = vmov 0   ;;  %vm311_vm1 = vcmask 257024   ;;  %s588_s0 = inlined_call_operand.vmem [shape: f32[64,32], index: 0, kind: input, shape index: {}]   ;;  %s589_s1 = inlined_call_operand.vmem [shape: f32[64,1], index: 1, kind: input, shape index: {}]   ;;  %s590_s2 = inlined_call_operand.vmem [shape: f32[64,1], index: 2, kind: input, shape index: {}]   ;;  %s591_s3 = inlined_call_operand.vmem [shape: bf16[64,32], index: 3, kind: output, shape index: {}]  }
   0x1   :  { %v383_v0 = vld [vmem:[%s588_s0 + $0x10] sm:$0xff]  ;;  %v388_v1 = vld [vmem:[%s588_s0] sm:$0xff]  ;;  %v393_v2 = vld [vmem:[%s588_s0 + $0x18] sm:$0xff]  ;;  %342 = vset.pattern.permute.xlu1 %v359_v32  ;;  %341 = vset.pattern.permute.xlu0 %v359_v32 }
   0x2   :  { %v29_v3 = vsel %vm22_vm0, %v383_v0, 0.0  ;;  %v23_v4 = vsel %vm22_vm0, %v388_v1, 0.0  ;;  %v402_v5 = vld [vmem:[%s588_s0 + $0x8] sm:$0xff]  ;;  %v32_v6 = vsel %vm22_vm0, %v393_v2, 0.0  ;;  %v416_v9 = vld [vmem:[%s588_s0 + $0x20] sm:$0xff]  ;;  %v425_v12 = vld [vmem:[%s588_s0 + $0x38] sm:$0xff]  ;;  %v55_v17 = vmul.f32 %v388_v1, %v388_v1 }
   0x3   :  { %30 = vadd.xlane.f32.xlu1 %v29_v3  ;;  %24 = vadd.xlane.f32.xlu0 %v23_v4  ;;  %v26_v7 = vsel %vm22_vm0, %v402_v5, 0.0  ;;  %v411_v8 = vld [vmem:[%s588_s0 + $0x28] sm:$0xff]  ;;  %v35_v11 = vsel %vm22_vm0, %v416_v9, 0.0  ;;  %v430_v13 = vld [vmem:[%s588_s0 + $0x30] sm:$0xff]  ;;  %v44_v14 = vsel %vm22_vm0, %v425_v12, 0.0  ;;  %v56_v16 = vmul.f32 %v402_v5, %v402_v5 }
   0x4   :  { %v38_v10 = vsel %vm22_vm0, %v411_v8, 0.0  ;;  %v41_v15 = vsel %vm22_vm0, %v430_v13, 0.0  ;;  %v63_v19 = vsel %vm22_vm0, %v55_v17, 0.0  ;;  %v58_v20 = vmul.f32 %v393_v2, %v393_v2 }
   0x5   :  { %v66_v18 = vsel %vm22_vm0, %v56_v16, 0.0  ;;  %v57_v21 = vmul.f32 %v383_v0, %v383_v0  ;;  %v60_v24 = vmul.f32 %v411_v8, %v411_v8  ;;  %v59_v25 = vmul.f32 %v416_v9, %v416_v9 }
   0x6   :  { %v72_v22 = vsel %vm22_vm0, %v58_v20, 0.0  ;;  %v62_v28 = vmul.f32 %v425_v12, %v425_v12  ;;  %v61_v29 = vmul.f32 %v430_v13, %v430_v13 }
   0x7   :  { %33 = vadd.xlane.f32.xlu1 %v32_v6  ;;  %27 = vadd.xlane.f32.xlu0 %v26_v7  ;;  %v69_v23 = vsel %vm22_vm0, %v57_v21, 0.0  ;;  %v78_v26 = vsel %vm22_vm0, %v60_v24, 0.0  ;;  %v75_v27 = vsel %vm22_vm0, %v59_v25, 0.0 }
   0x8   :  { %v84_v30 = vsel %vm22_vm0, %v62_v28, 0.0  ;;  %v81_v31 = vsel %vm22_vm0, %v61_v29, 0.0 }
   0xb   :  { %39 = vadd.xlane.f32.xlu1 %v38_v10  ;;  %36 = vadd.xlane.f32.xlu0 %v35_v11 }
   0xf   :  { %45 = vadd.xlane.f32.xlu1 %v44_v14  ;;  %42 = vadd.xlane.f32.xlu0 %v41_v15 }
  0x13   :  { %67 = vadd.xlane.f32.xlu1 %v66_v18  ;;  %64 = vadd.xlane.f32.xlu0 %v63_v19 }
  0x17   :  { %73 = vadd.xlane.f32.xlu1 %v72_v22  ;;  %70 = vadd.xlane.f32.xlu0 %v69_v23 }
  0x1b   :  { %79 = vadd.xlane.f32.xlu1 %v78_v26  ;;  %76 = vadd.xlane.f32.xlu0 %v75_v27 }
  0x1f   :  { %85 = vadd.xlane.f32.xlu1 %v84_v30  ;;  %82 = vadd.xlane.f32.xlu0 %v81_v31 }
  0x8c   :  { %v31_v33 = vpop.xlane.xlu1 %30  ;;  %v25_v34 = vpop.xlane.xlu0 %24 }
  0x8d   :  { %v460_v41 = vmul.f32 0.03125, %v25_v34  ;;  %v464_v43 = vmul.f32 0.03125, %v31_v33 }
  0x8f   :  { %v95_v47 = vmul.f32 %v460_v41, %v460_v41  ;;  %v97_v53 = vmul.f32 %v464_v43, %v464_v43 }
  0x90   :  { %v34_v35 = vpop.xlane.xlu1 %33  ;;  %v28_v36 = vpop.xlane.xlu0 %27 }
  0x91   :  { %v462_v42 = vmul.f32 0.03125, %v28_v36  ;;  %v466_v44 = vmul.f32 0.03125, %v34_v35 }
  0x93   :  { %v96_v48 = vmul.f32 %v462_v42, %v462_v42  ;;  %v98_v54 = vmul.f32 %v466_v44, %v466_v44 }
  0x94   :  { %v40_v37 = vpop.xlane.xlu1 %39  ;;  %v37_v38 = vpop.xlane.xlu0 %36 }
  0x95   :  { %v476_v55 = vmul.f32 0.03125, %v40_v37  ;;  %v478_v62 = vmul.f32 0.03125, %v37_v38 }
  0x97   :  { %v100_v7 = vmul.f32 %v476_v55, %v476_v55  ;;  %v99_v18 = vmul.f32 %v478_v62, %v478_v62 }
  0x98   :  { %v46_v39 = vpop.xlane.xlu1 %45  ;;  %v43_v40 = vpop.xlane.xlu0 %42 }
  0x99   :  { %v482_v10 = vmul.f32 0.03125, %v46_v39  ;;  %v486_v19 = vmul.f32 0.03125, %v43_v40  ;;  %v136_v40 = vld [vmem:[%s589_s1 + $0x8] sm:$0xff] }
  0x9b   :  { %v102_v24 = vmul.f32 %v482_v10, %v482_v10  ;;  %v101_v31 = vmul.f32 %v486_v19, %v486_v19 }
  0x9c   :  { %v68_v45 = vpop.xlane.xlu1 %67  ;;  %v65_v46 = vpop.xlane.xlu0 %64 }
  0x9d   :  { %v88_v49 = vmul.f32 0.03125, %v68_v45  ;;  %v87_v50 = vmul.f32 0.03125, %v65_v46  ;;  %v135_v45 = vld [vmem:[%s589_s1] sm:$0xff] }
  0x9f   :  { %v104_v51 = vsub.f32 %v88_v49, %v96_v48  ;;  %v103_v52 = vsub.f32 %v87_v50, %v95_v47 }
  0xa0   :  { %v74_v56 = vpop.xlane.xlu1 %73  ;;  %v71_v57 = vpop.xlane.xlu0 %70 }
  0xa1   :  { %v112_v58 = vmax.f32 %v104_v51, 0.0  ;;  %v111_v59 = vmax.f32 %v103_v52, 0.0  ;;  %v90_v60 = vmul.f32 0.03125, %v74_v56  ;;  %v89_v61 = vmul.f32 0.03125, %v71_v57  ;;  %v152_v51 = vld [vmem:[%s590_s2 + $0x8] sm:$0xff]  ;;  %v138_v52 = vld [vmem:[%s589_s1 + $0x18] sm:$0xff] }
  0xa3   :  { %v120_v63 = vadd.f32 1e-05, %v112_v58  ;;  %v119_v3 = vadd.f32 1e-05, %v111_v59  ;;  %v106_v4 = vsub.f32 %v90_v60, %v98_v54  ;;  %v105_v6 = vsub.f32 %v89_v61, %v97_v53  ;;  %v137_v54 = vld [vmem:[%s589_s1 + $0x10] sm:$0xff]  ;;  %v154_v61 = vld [vmem:[%s590_s2 + $0x18] sm:$0xff] }
  0xa4   :  { %v80_v11 = vpop.xlane.xlu1 %79  ;;  %v77_v14 = vpop.xlane.xlu0 %76 }
  0xa5   :  { %343 = vrsqrt.f32 %v120_v63  ;;  %v114_v15 = vmax.f32 %v106_v4, 0.0  ;;  %v113_v16 = vmax.f32 %v105_v6, 0.0  ;;  %v92_v17 = vmul.f32 0.03125, %v80_v11  ;;  %v140_v63 = vld [vmem:[%s589_s1 + $0x28] sm:$0xff]  ;;  %v142_v11 = vld [vmem:[%s589_s1 + $0x38] sm:$0xff] }
  0xa6   :  { %345 = vrsqrt.f32 %v119_v3  ;;  %v91_v20 = vmul.f32 0.03125, %v77_v14 }
  0xa7   :  { %v122_v21 = vadd.f32 1e-05, %v114_v15  ;;  %v121_v22 = vadd.f32 1e-05, %v113_v16  ;;  %v108_v23 = vsub.f32 %v92_v17, %v100_v7  ;;  %v156_v7 = vld [vmem:[%s590_s2 + $0x28] sm:$0xff] }
  0xa8   :  { %v107_v25 = vsub.f32 %v91_v20, %v99_v18  ;;  %v86_v26 = vpop.xlane.xlu1 %85  ;;  %v83_v27 = vpop.xlane.xlu0 %82 }
  0xa9   :  { %347 = vrsqrt.f32 %v122_v21  ;;  %v116_v28 = vmax.f32 %v108_v23, 0.0  ;;  %v94_v29 = vmul.f32 0.03125, %v86_v26  ;;  %v93_v30 = vmul.f32 0.03125, %v83_v27  ;;  %v158_v21 = vld [vmem:[%s590_s2 + $0x38] sm:$0xff]  ;;  %v151_v27 = vld [vmem:[%s590_s2] sm:$0xff] }
  0xaa   :  { %349 = vrsqrt.f32 %v121_v22  ;;  %v115_v32 = vmax.f32 %v107_v25, 0.0 }
  0xab   :  { %v124_v33 = vadd.f32 1e-05, %v116_v28  ;;  %v110_v34 = vsub.f32 %v94_v29, %v102_v24  ;;  %v109_v36 = vsub.f32 %v93_v30, %v101_v31  ;;  %v141_v24 = vld [vmem:[%s589_s1 + $0x30] sm:$0xff] }
  0xac   :  { %v123_v35 = vadd.f32 1e-05, %v115_v32  ;;  %v153_v29 = vld [vmem:[%s590_s2 + $0x10] sm:$0xff] }
  0xad   :  { %351 = vrsqrt.f32 %v124_v33  ;;  %v118_v37 = vmax.f32 %v110_v34, 0.0  ;;  %v117_v39 = vmax.f32 %v109_v36, 0.0 }
  0xae   :  { %353 = vrsqrt.f32 %v123_v35 }
  0xaf   :  { %v126_v38 = vadd.f32 1e-05, %v118_v37  ;;  %v125_v49 = vadd.f32 1e-05, %v117_v39 }
  0xb1   :  { %355 = vrsqrt.f32 %v126_v38 }
  0xb2   :  { %v344_v46 = vpop.eup %343  ;;  %357 = vrsqrt.f32 %v125_v49 }
  0xb3   :  { %v346_v47 = vpop.eup %345  ;;  %v144_v48 = vmul.f32 %v344_v46, %v136_v40 }
  0xb4   :  { %v143_v50 = vmul.f32 %v346_v47, %v135_v45 }
  0xb5   :  { %182 = vperm.xlu1 %342, %v144_v48   ;;  %v160_v53 = vmul.f32 %v144_v48, %v462_v42 }
  0xb6   :  { %v348_v56 = vpop.eup %347  ;;  %177 = vperm.xlu0 %341, %v143_v50   ;;  %v159_v26 = vmul.f32 %v143_v50, %v460_v41  ;;  %v155_v41 = vld [vmem:[%s590_s2 + $0x20] sm:$0xff] }
  0xb7   :  { %v350_v57 = vpop.eup %349  ;;  %v168_v58 = vsub.f32 %v152_v51, %v160_v53  ;;  %v146_v59 = vmul.f32 %v348_v56, %v138_v52 }
  0xb8   :  { %v145_v60 = vmul.f32 %v350_v57, %v137_v54 }
  0xb9   :  { %v162_v42 = vmul.f32 %v146_v59, %v466_v44  ;;  %v139_v44 = vld [vmem:[%s589_s1 + $0x20] sm:$0xff] }
  0xba   :  { %v352_v3 = vpop.eup %351  ;;  %230 = vperm.xlu0 %341, %v168_v58   ;;  %187 = vperm.xlu1 %342, %v145_v60   ;;  %v161_v28 = vmul.f32 %v145_v60, %v464_v43  ;;  %v157_v43 = vld [vmem:[%s590_s2 + $0x30] sm:$0xff] }
  0xbb   :  { %v170_v4 = vsub.f32 %v154_v61, %v162_v42  ;;  %v148_v6 = vmul.f32 %v352_v3, %v140_v63  ;;  %v354_v14 = vpop.eup %353 }
  0xbc   :  { %v147_v20 = vmul.f32 %v354_v14, %v139_v44  ;;  %v169_v30 = vsub.f32 %v153_v29, %v161_v28 }
  0xbd   :  { %v164_v15 = vmul.f32 %v148_v6, %v476_v55 }
  0xbe   :  { %v356_v16 = vpop.eup %355  ;;  %240 = vperm.xlu0 %341, %v170_v4   ;;  %192 = vperm.xlu1 %342, %v146_v59   ;;  %v163_v31 = vmul.f32 %v147_v20, %v478_v62 }
  0xbf   :  { %v172_v17 = vsub.f32 %v156_v7, %v164_v15  ;;  %v150_v18 = vmul.f32 %v356_v16, %v142_v11  ;;  %v358_v55 = vpop.eup %357 }
  0xc0   :  { %v149_v25 = vmul.f32 %v358_v55, %v141_v24  ;;  %v171_v32 = vsub.f32 %v155_v41, %v163_v31 }
  0xc1   :  { %v166_v22 = vmul.f32 %v150_v18, %v482_v10  ;;  %v167_v10 = vsub.f32 %v151_v27, %v159_v26 }
  0xc2   :  { %250 = vperm.xlu0 %341, %v172_v17   ;;  %197 = vperm.xlu1 %342, %v147_v20   ;;  %v165_v33 = vmul.f32 %v149_v25, %v486_v19 }
  0xc3   :  { %v174_v23 = vsub.f32 %v158_v21, %v166_v22 }
  0xc4   :  { %v173_v34 = vsub.f32 %v157_v43, %v165_v33 }
  0xc6   :  { %260 = vperm.xlu0 %341, %v174_v23   ;;  %202 = vperm.xlu1 %342, %v148_v6  }
  0xca   :  { %207 = vperm.xlu1 %342, %v149_v25  }
  0xce   :  { %212 = vperm.xlu1 %342, %v150_v18  }
  0xd2   :  { %225 = vperm.xlu1 %342, %v167_v10  }
  0xd6   :  { %235 = vperm.xlu1 %342, %v169_v30  }
  0xda   :  { %245 = vperm.xlu1 %342, %v171_v32  }
  0xde   :  { %255 = vperm.xlu1 %342, %v173_v34  }
 0x130   :  { %v183_v35 = vpop.permute.xlu1 %182 }
 0x131   :  { %v178_v36 = vpop.permute.xlu0 %177  ;;  %v216_v37 = vmul.f32 %v183_v35, %v402_v5 }
 0x132   :  { %v215_v61 = vmul.f32 %v178_v36, %v388_v1 }
 0x135   :  { %v188_v62 = vpop.permute.xlu1 %187  ;;  %v231_v38 = vpop.permute.xlu0 %230 }
 0x136   :  { %v264_v39 = vadd.f32 %v231_v38, %v216_v37  ;;  %v217_v4 = vmul.f32 %v188_v62, %v383_v0 }
 0x138   :  { %v272_v40 = vmax.f32 %v264_v39, 0.0 }
 0x139   :  { %v193_v45 = vpop.permute.xlu1 %192  ;;  %v241_v47 = vpop.permute.xlu0 %240 }
 0x13a   :  { %v333_v46 = vpack.c.bf16 %v272_v40, %v272_v40  ;;  %v218_v19 = vmul.f32 %v193_v45, %v393_v2 }
 0x13c   :  { %313 = vst.msk [vmem:[%s591_s3 + $0x4] sm:$0xf] %vm311_vm1, %v333_v46  ;;  %v266_v48 = vadd.f32 %v241_v47, %v218_v19 }
 0x13d   :  { %v198_v49 = vpop.permute.xlu1 %197  ;;  %v251_v53 = vpop.permute.xlu0 %250 }
 0x13e   :  { %v274_v50 = vmax.f32 %v266_v48, 0.0 }
 0x140   :  { %v335_v51 = vpack.c.bf16 %v274_v50, %v274_v50 }
 0x141   :  { %v203_v5 = vpop.permute.xlu1 %202  ;;  %v261_v60 = vpop.permute.xlu0 %260 }
 0x142   :  { %315 = vst.msk [vmem:[%s591_s3 + $0xc] sm:$0xf] %vm311_vm1, %v335_v51  ;;  %v220_v52 = vmul.f32 %v203_v5, %v411_v8 }
 0x144   :  { %v268_v2 = vadd.f32 %v251_v53, %v220_v52 }
 0x145   :  { %v208_v54 = vpop.permute.xlu1 %207 }
 0x146   :  { %v276_v56 = vmax.f32 %v268_v2, 0.0  ;;  %v221_v17 = vmul.f32 %v208_v54, %v430_v13 }
 0x148   :  { %v337_v57 = vpack.c.bf16 %v276_v56, %v276_v56 }
 0x149   :  { %v213_v58 = vpop.permute.xlu1 %212 }
 0x14a   :  { %317 = vst.msk [vmem:[%s591_s3 + $0x14] sm:$0xf] %vm311_vm1, %v337_v57  ;;  %v222_v59 = vmul.f32 %v213_v58, %v425_v12  ;;  %v219_v12 = vmul.f32 %v198_v49, %v416_v9 }
 0x14c   :  { %v270_v63 = vadd.f32 %v261_v60, %v222_v59 }
 0x14d   :  { %v226_v42 = vpop.permute.xlu1 %225 }
 0x14e   :  { %v278_v3 = vmax.f32 %v270_v63, 0.0  ;;  %v263_v8 = vadd.f32 %v226_v42, %v215_v61 }
 0x150   :  { %v339_v6 = vpack.c.bf16 %v278_v3, %v278_v3  ;;  %v271_v7 = vmax.f32 %v263_v8, 0.0 }
 0x151   :  { %v236_v11 = vpop.permute.xlu1 %235 }
 0x152   :  { %319 = vst.msk [vmem:[%s591_s3 + $0x1c] sm:$0xf] %vm311_vm1, %v339_v6  ;;  %v332_v14 = vpack.c.bf16 %v271_v7, %v271_v7  ;;  %v265_v15 = vadd.f32 %v236_v11, %v217_v4 }
 0x154   :  { %312 = vst.msk [vmem:[%s591_s3] sm:$0xf] %vm311_vm1, %v332_v14  ;;  %v273_v1 = vmax.f32 %v265_v15, 0.0 }
 0x155   :  { %v246_v44 = vpop.permute.xlu1 %245 }
 0x156   :  { %v334_v0 = vpack.c.bf16 %v273_v1, %v273_v1  ;;  %v267_v16 = vadd.f32 %v246_v44, %v219_v12 }
 0x158   :  { %314 = vst.msk [vmem:[%s591_s3 + $0x8] sm:$0xf] %vm311_vm1, %v334_v0  ;;  %v275_v18 = vmax.f32 %v267_v16, 0.0 }
 0x159   :  { %v256_v20 = vpop.permute.xlu1 %255 }
 0x15a   :  { %v336_v21 = vpack.c.bf16 %v275_v18, %v275_v18  ;;  %v269_v9 = vadd.f32 %v256_v20, %v221_v17 }
 0x15c   :  { %316 = vst.msk [vmem:[%s591_s3 + $0x10] sm:$0xf] %vm311_vm1, %v336_v21  ;;  %v277_v22 = vmax.f32 %v269_v9, 0.0 }
 0x15e   :  { %v338_v23 = vpack.c.bf16 %v277_v22, %v277_v22 }
 0x160   :  { %318 = vst.msk [vmem:[%s591_s3 + $0x18] sm:$0xf] %vm311_vm1, %v338_v23 }

// kernel: generator_forward.11
= control target key start
LH: loop header
LB: loop body
LE: loop exit
PB: predicated region body
PF: predicated region fallthrough
CT: control target
= control target key end

     0   :  { %s662_s9 = smov 0   ;;  %s664_s10 = smov 0   ;;  %s724_s0 = inlined_call_operand.vmem [shape: bf16[4,256,32], index: 0, kind: input, shape index: {}]   ;;  %s725_s1 = inlined_call_operand.vmem [shape: bf16[4,32,256], index: 1, kind: input, shape index: {}]   ;;  %s726_s2 = inlined_call_operand.vmem [shape: f32[4,32,32], index: 2, kind: output, shape index: {}]  }
   0x1   :  { %s666_s11 = smov 0  }
   0x2 LB: > { %s24_s12 = sadd.s32 1, %s641_s10  ;;  %p501_p0 = scmp.ge.s32.totalorder %s645_s11, 1  ;;  %s645_s11 = sphi %s666_s11, %s12_s11   ;;  %s641_s10 = sphi %s664_s10, %s728_s10   ;;  %s637_s9 = sphi %s662_s9, %s727_s9  }
   0x3   : > { %p26_p1 = scmp.ge.s32.totalorder %s24_s12, 4  ;;  %p141_p2 = scmp.lt.s32.totalorder %s645_s11, 5 }
   0x5   : > { %s730_s12 = smov (%p26_p1, %s24_s12), 0  ;;  %p142_p3 = pnand %p501_p0, %p141_p2 }
   0x6   : > { %p174_p4 = scmp.lt.s32.totalorder (!%p142_p3), %s637_s9, 3 }
   0x7   : > { %145 = sbr.rel (%p142_p3) target bundleno = 250 (0xfa), region = 28 }
   0xc   : > { %s732_s9 = smov (!%p174_p4, %s637_s9), 3  ;;  %vm397_vm0 = vcmask 261120  }
   0xd   : > { %s530_s13 = sshll.u32 %s732_s9, 7  ;;  %s531_s17 = sshll.u32 %s732_s9, 5 }
   0xe   : > { %s686_s16 = scalar_lea.vmem %s724_s0, %s530_s13  ;;  %s186_s20 = scalar_lea.vmem %s725_s1, %s531_s17 }
   0xf   : > { %v601_v0 = vld [vmem:[%s686_s16 + $0x78] sm:$0xff]   ;;  %v603_v2 = vld [vmem:[%s686_s16 + $0x70] sm:$0xff]   ;;  %v605_v4 = vld [vmem:[%s686_s16 + $0x68] sm:$0xff]   ;;  %s194_s23 = scalar_lea.vmem %s726_s2, %s531_s17 }
  0x10   : > { %v602_v1 = vld [vmem:[%s686_s16 + $0x38] sm:$0xff]   ;;  %533 = vmatprep.subr.bf16.mxu0 %v601_v0  ;;  %561 = vmatprep.subr.bf16.mxu1 %v601_v0  ;;  %v604_v3 = vld [vmem:[%s686_s16 + $0x30] sm:$0xff]   ;;  %v606_v5 = vld [vmem:[%s686_s16 + $0x28] sm:$0xff]  }
  0x11   : > { %534 = vmatpush3.bf16.msra.mxu0 %v602_v1  ;;  %569 = vmatpush3.bf16.msra.mxu1 %v602_v1  ;;  %v607_v6 = vld [vmem:[%s686_s16 + $0x60] sm:$0xff]   ;;  %v609_v8 = vld [vmem:[%s686_s16 + $0x58] sm:$0xff]   ;;  %v611_v10 = vld [vmem:[%s686_s16 + $0x50] sm:$0xff]  }
  0x12   : > { %535 = vmatprep.subr.bf16.mxu0 %v603_v2  ;;  %562 = vmatprep.subr.bf16.mxu1 %v603_v2  ;;  %v608_v7 = vld [vmem:[%s686_s16 + $0x20] sm:$0xff]   ;;  %v610_v9 = vld [vmem:[%s686_s16 + $0x18] sm:$0xff]   ;;  %v612_v13 = vld [vmem:[%s686_s16 + $0x10] sm:$0xff]  }
  0x13   : > { %v619_v11 = vld [vmem:[%s186_s20 + $0x4] ss:$8 sps:$4 sm:$0xff]   ;;  %v622_v12 = vld [vmem:[%s186_s20 + $0x14] ss:$8 sps:$4 sm:$0xff]   ;;  %v617_v18 = vld [vmem:[%s186_s20] ss:$8 sps:$4 sm:$0xff]  }
  0x14   : > { %v613_v14 = vld [vmem:[%s686_s16 + $0x48] sm:$0xff]   ;;  %380 = vmatprep.mubr.bf16.mxu0 %v619_v11  ;;  %388 = vmatprep.mubr.bf16.mxu1 %v622_v12  ;;  %v615_v16 = vld [vmem:[%s686_s16 + $0x40] sm:$0xff]   ;;  %v620_v19 = vld [vmem:[%s186_s20 + $0x10] ss:$8 sps:$4 sm:$0xff]  }
  0x15   : > { %536 = vmatpush3.bf16.msra.mxu0 %v604_v3  ;;  %570 = vmatpush3.bf16.msra.mxu1 %v604_v3  ;;  %v614_v15 = vld [vmem:[%s686_s16 + $0x8] sm:$0xff]   ;;  %v616_v17 = vld [vmem:[%s686_s16] sm:$0xff]  }
  0x16   : > { %537 = vmatprep.subr.bf16.mxu0 %v605_v4  ;;  %563 = vmatprep.subr.bf16.mxu1 %v605_v4 }
  0x19   : > { %538 = vmatpush3.bf16.msra.mxu0 %v606_v5  ;;  %571 = vmatpush3.bf16.msra.mxu1 %v606_v5 }
  0x1a   : > { %539 = vmatprep.subr.bf16.mxu0 %v607_v6  ;;  %564 = vmatprep.subr.bf16.mxu1 %v607_v6 }
  0x1d   : > { %540 = vmatpush3.bf16.msra.mxu0 %v608_v7  ;;  %572 = vmatpush3.bf16.msra.mxu1 %v608_v7 }
  0x1e   : > { %541 = vmatprep.subr.bf16.mxu0 %v609_v8  ;;  %565 = vmatprep.subr.bf16.mxu1 %v609_v8 }
  0x21   : > { %542 = vmatpush3.bf16.msra.mxu0 %v610_v9  ;;  %573 = vmatpush3.bf16.msra.mxu1 %v610_v9 }
  0x22   : > { %543 = vmatprep.subr.bf16.mxu0 %v611_v10  ;;  %566 = vmatprep.subr.bf16.mxu1 %v611_v10 }
  0x25   : > { %544 = vmatpush3.bf16.msra.mxu0 %v612_v13  ;;  %574 = vmatpush3.bf16.msra.mxu1 %v612_v13 }
  0x26   : > { %545 = vmatprep.subr.bf16.mxu0 %v613_v14  ;;  %567 = vmatprep.subr.bf16.mxu1 %v613_v14 }
  0x29   : > { %546 = vmatpush3.bf16.msra.mxu0 %v614_v15  ;;  %575 = vmatpush3.bf16.msra.mxu1 %v614_v15 }
  0x2a   : > { %547 = vmatprep.subr.bf16.mxu0 %v615_v16  ;;  %568 = vmatprep.subr.bf16.mxu1 %v615_v16 }
  0x2d   : > { %548 = vmatpush3.bf16.msra.mxu0 %v616_v17  ;;  %576 = vmatpush3.bf16.msra.mxu1 %v616_v17 }
  0x30   : > { %381 = vmatmul.mubr.bf16.vlgmr.msra.gmra.mxu0 %v617_v18  ;;  %389 = vmatmul.mubr.bf16.vlgmr.msra.gmra.mxu1 %v620_v19 }
  0xf0   : > { %v549_v20 = vpop.f32.mrf.mxu0  ;;  %v555_v21 = vpop.f32.mrf.mxu1 }
  0xf2   : > { %v550_v22 = vpop.f32.mrf.mxu0  ;;  %v556_v23 = vpop.f32.mrf.mxu1 }
  0xf3   : > { %v551_v24 = vadd.f32 %v550_v22, %v549_v20  ;;  %v557_v25 = vadd.f32 %v556_v23, %v555_v21 }
  0xf4   : > { %v552_v26 = vpop.f32.mrf.mxu0  ;;  %v558_v27 = vpop.f32.mrf.mxu1 }
  0xf5   : > { %398 = vst.msk [vmem:[%s194_s23] sm:$0xff] %vm397_vm0, %v551_v24  ;;  %400 = vst.msk [vmem:[%s194_s23 + $0x10] sm:$0xff] %vm397_vm0, %v557_v25 }
  0xf6   : > { %v553_v28 = vpop.f32.mrf.mxu0  ;;  %v559_v29 = vpop.f32.mrf.mxu1 }
  0xf7   : > { %v554_v30 = vadd.f32 %v553_v28, %v552_v26  ;;  %v560_v31 = vadd.f32 %v559_v29, %v558_v27 }
  0xf9   : > { %399 = vst.msk [vmem:[%s194_s23 + $0x8] sm:$0xff] %vm397_vm0, %v554_v30  ;;  %401 = vst.msk [vmem:[%s194_s23 + $0x18] sm:$0xff] %vm397_vm0, %v560_v31 }
  0xfa PF: > { %s12_s11 = sadd.s32 1, %s645_s11   ;;  %s727_s9 = smov %s641_s10 }
  0xfb   : > { %p9_p5 = scmp.ge.s32.totalorder %s12_s11, 6   ;;  %s728_s10 = smov %s730_s12 }
  0xfd   :  { %11 = sbr.rel (!%p9_p5) target bundleno = 2 (0x2), region = 61 }

// kernel: generator_forward.12
= control target key start
LH: loop header
LB: loop body
LE: loop exit
PB: predicated region body
PF: predicated region fallthrough
CT: control target
= control target key end

     0   :  { %v192_v8 = vmov 0   ;;  %s279_s0 = inlined_call_operand.vmem [shape: f32[32,128], index: 0, kind: input, shape index: {}]   ;;  %s280_s1 = inlined_call_operand.vmem [shape: f32[32,1], index: 1, kind: input, shape index: {}]   ;;  %s281_s2 = inlined_call_operand.vmem [shape: f32[32,1], index: 2, kind: input, shape index: {}]   ;;  %s282_s3 = inlined_call_operand.vmem [shape: bf16[32,128], index: 3, kind: output, shape index: {}]  }
   0x1   :  { %v216_v0 = vld [vmem:[%s279_s0 + $0x10] sm:$0xff]  ;;  %v221_v1 = vld [vmem:[%s279_s0] sm:$0xff]  ;;  %v228_v2 = vld [vmem:[%s279_s0 + $0x18] sm:$0xff]  ;;  %183 = vset.pattern.permute.xlu1 %v192_v8  ;;  %182 = vset.pattern.permute.xlu0 %v192_v8 }
   0x2   :  { %22 = vadd.xlane.f32.xlu1 %v216_v0  ;;  %18 = vadd.xlane.f32.xlu0 %v221_v1  ;;  %v233_v3 = vld [vmem:[%s279_s0 + $0x8] sm:$0xff]  ;;  %v30_v5 = vmul.f32 %v221_v1, %v221_v1  ;;  %v33_v6 = vmul.f32 %v228_v2, %v228_v2  ;;  %v32_v7 = vmul.f32 %v216_v0, %v216_v0  ;;  %v66_v42 = vld [vmem:[%s280_s1] sm:$0xff]  ;;  %v68_v47 = vld [vmem:[%s280_s1 + $0x10] sm:$0xff] }
   0x3   :  { %v31_v4 = vmul.f32 %v233_v3, %v233_v3  ;;  %v67_v41 = vld [vmem:[%s280_s1 + $0x8] sm:$0xff]  ;;  %v69_v51 = vld [vmem:[%s280_s1 + $0x18] sm:$0xff]  ;;  %v74_v54 = vld [vmem:[%s281_s2] sm:$0xff] }
   0x4   :  { %v75_v57 = vld [vmem:[%s281_s2 + $0x8] sm:$0xff]  ;;  %v76_v60 = vld [vmem:[%s281_s2 + $0x10] sm:$0xff]  ;;  %v77_v63 = vld [vmem:[%s281_s2 + $0x18] sm:$0xff] }
   0x6   :  { %24 = vadd.xlane.f32.xlu1 %v228_v2  ;;  %20 = vadd.xlane.f32.xlu0 %v233_v3 }
   0xa   :  { %36 = vadd.xlane.f32.xlu1 %v31_v4  ;;  %34 = vadd.xlane.f32.xlu0 %v30_v5 }
   0xe   :  { %40 = vadd.xlane.f32.xlu1 %v33_v6  ;;  %38 = vadd.xlane.f32.xlu0 %v32_v7 }
  0x8b   :  { %v23_v9 = vpop.xlane.xlu1 %22  ;;  %v19_v10 = vpop.xlane.xlu0 %18 }
  0x8c   :  { %v26_v13 = vmul.f32 0.0078125, %v19_v10  ;;  %v28_v15 = vmul.f32 0.0078125, %v23_v9 }
  0x8e   :  { %v46_v19 = vmul.f32 %v26_v13, %v26_v13  ;;  %v48_v25 = vmul.f32 %v28_v15, %v28_v15 }
  0x8f   :  { %v25_v11 = vpop.xlane.xlu1 %24  ;;  %v21_v12 = vpop.xlane.xlu0 %20 }
  0x90   :  { %v27_v14 = vmul.f32 0.0078125, %v21_v12  ;;  %v29_v16 = vmul.f32 0.0078125, %v25_v11 }
  0x92   :  { %v47_v20 = vmul.f32 %v27_v14, %v27_v14  ;;  %v49_v26 = vmul.f32 %v29_v16, %v29_v16 }
  0x93   :  { %v37_v17 = vpop.xlane.xlu1 %36  ;;  %v35_v18 = vpop.xlane.xlu0 %34 }
  0x94   :  { %v43_v21 = vmul.f32 0.0078125, %v37_v17  ;;  %v42_v22 = vmul.f32 0.0078125, %v35_v18 }
  0x96   :  { %v51_v23 = vsub.f32 %v43_v21, %v47_v20  ;;  %v50_v24 = vsub.f32 %v42_v22, %v46_v19 }
  0x97   :  { %v41_v27 = vpop.xlane.xlu1 %40  ;;  %v39_v28 = vpop.xlane.xlu0 %38 }
  0x98   :  { %v55_v29 = vmax.f32 %v51_v23, 0.0  ;;  %v54_v30 = vmax.f32 %v50_v24, 0.0  ;;  %v45_v31 = vmul.f32 0.0078125, %v41_v27  ;;  %v44_v32 = vmul.f32 0.0078125, %v39_v28 }
  0x9a   :  { %v59_v33 = vadd.f32 1e-05, %v55_v29  ;;  %v58_v34 = vadd.f32 1e-05, %v54_v30  ;;  %v53_v35 = vsub.f32 %v45_v31, %v49_v26  ;;  %v52_v36 = vsub.f32 %v44_v32, %v48_v25 }
  0x9c   :  { %184 = vrsqrt.f32 %v59_v33  ;;  %v57_v37 = vmax.f32 %v53_v35, 0.0  ;;  %v56_v38 = vmax.f32 %v52_v36, 0.0 }
  0x9d   :  { %186 = vrsqrt.f32 %v58_v34 }
  0x9e   :  { %v60_v39 = vadd.f32 1e-05, %v56_v38  ;;  %v61_v40 = vadd.f32 1e-05, %v57_v37 }
  0xa0   :  { %188 = vrsqrt.f32 %v60_v39 }
  0xa1   :  { %190 = vrsqrt.f32 %v61_v40 }
  0xa9   :  { %v185_v43 = vpop.eup %184 }
  0xaa   :  { %v187_v44 = vpop.eup %186  ;;  %v71_v45 = vmul.f32 %v185_v43, %v67_v41 }
  0xab   :  { %v70_v46 = vmul.f32 %v187_v44, %v66_v42 }
  0xac   :  { %93 = vperm.xlu1 %183, %v71_v45   ;;  %v79_v56 = vmul.f32 %v71_v45, %v27_v14 }
  0xad   :  { %88 = vperm.xlu0 %182, %v70_v46   ;;  %v189_v48 = vpop.eup %188  ;;  %v78_v53 = vmul.f32 %v70_v46, %v26_v13 }
  0xae   :  { %v72_v49 = vmul.f32 %v189_v48, %v68_v47  ;;  %v191_v50 = vpop.eup %190  ;;  %v83_v58 = vsub.f32 %v75_v57, %v79_v56 }
  0xaf   :  { %v73_v52 = vmul.f32 %v191_v50, %v69_v51  ;;  %v82_v55 = vsub.f32 %v74_v54, %v78_v53 }
  0xb0   :  { %98 = vperm.xlu1 %183, %v72_v49   ;;  %v80_v59 = vmul.f32 %v72_v49, %v28_v15 }
  0xb1   :  { %v81_v62 = vmul.f32 %v73_v52, %v29_v16 }
  0xb2   :  { %v84_v61 = vsub.f32 %v76_v60, %v80_v59 }
  0xb3   :  { %v85_v4 = vsub.f32 %v77_v63, %v81_v62 }
  0xb4   :  { %103 = vperm.xlu1 %183, %v73_v52  }
  0xb8   :  { %112 = vperm.xlu1 %183, %v82_v55  }
  0xbc   :  { %117 = vperm.xlu1 %183, %v83_v58  }
  0xc0   :  { %122 = vperm.xlu1 %183, %v84_v61  }
  0xc4   :  { %127 = vperm.xlu1 %183, %v85_v4  }
 0x127   :  { %v94_v5 = vpop.permute.xlu1 %93 }
 0x128   :  { %v89_v8 = vpop.permute.xlu0 %88  ;;  %v107_v11 = vmul.f32 %v94_v5, %v233_v3 }
 0x129   :  { %v106_v10 = vmul.f32 %v89_v8, %v221_v1 }
 0x12b   :  { %v99_v6 = vpop.permute.xlu1 %98 }
 0x12c   :  { %v108_v18 = vmul.f32 %v99_v6, %v216_v0 }
 0x12f   :  { %v104_v7 = vpop.permute.xlu1 %103 }
 0x130   :  { %v109_v20 = vmul.f32 %v104_v7, %v228_v2 }
 0x133   :  { %v113_v9 = vpop.permute.xlu1 %112 }
 0x134   :  { %v130_v12 = vadd.f32 %v113_v9, %v106_v10 }
 0x136   :  { %v134_v15 = vmax.f32 %v130_v12, 0.0 }
 0x137   :  { %v118_v13 = vpop.permute.xlu1 %117 }
 0x138   :  { %v131_v14 = vadd.f32 %v118_v13, %v107_v11 }
 0x13a   :  { %v135_v16 = vmax.f32 %v131_v14, 0.0 }
 0x13b   :  { %v123_v17 = vpop.permute.xlu1 %122 }
 0x13c   :  { %v173_v19 = vpack.c.bf16 %v135_v16, %v134_v15  ;;  %v132_v21 = vadd.f32 %v123_v17, %v108_v18 }
 0x13e   :  { %174 = vst [vmem:[%s282_s3] sm:$0xff] %v173_v19   ;;  %v136_v23 = vmax.f32 %v132_v21, 0.0 }
 0x13f   :  { %v128_v22 = vpop.permute.xlu1 %127 }
 0x140   :  { %v133_v1 = vadd.f32 %v128_v22, %v109_v20 }
 0x142   :  { %v137_v3 = vmax.f32 %v133_v1, 0.0 }
 0x144   :  { %v178_v24 = vpack.c.bf16 %v137_v3, %v136_v23 }
 0x146   :  { %180 = vst [vmem:[%s282_s3 + $0x8] sm:$0xff] %v178_v24  }

// kernel: generator_forward.13
= control target key start
LH: loop header
LB: loop body
LE: loop exit
PB: predicated region body
PF: predicated region fallthrough
CT: control target
= control target key end

     0   :  { %s536_s9 = smov 0   ;;  %s538_s10 = smov 0   ;;  %s577_s0 = inlined_call_operand.vmem [shape: bf16[4,128,128], index: 0, kind: input, shape index: {}]   ;;  %s578_s1 = inlined_call_operand.vmem [shape: bf16[4,16,128], index: 1, kind: input, shape index: {}]   ;;  %s579_s2 = inlined_call_operand.vmem [shape: f32[4,16,128], index: 2, kind: output, shape index: {}]  }
   0x1   :  { %s540_s11 = smov 0  }
   0x2 LB: > { %s24_s12 = sadd.s32 1, %s513_s10  ;;  %p410_p0 = scmp.ge.s32.totalorder %s517_s11, 1  ;;  %s517_s11 = sphi %s540_s11, %s12_s11   ;;  %s513_s10 = sphi %s538_s10, %s581_s10   ;;  %s509_s9 = sphi %s536_s9, %s580_s9  }
   0x3   : > { %p26_p1 = scmp.ge.s32.totalorder %s24_s12, 4  ;;  %p141_p2 = scmp.lt.s32.totalorder %s517_s11, 5 }
   0x5   : > { %s583_s12 = smov (%p26_p1, %s24_s12), 0  ;;  %p142_p3 = pnand %p410_p0, %p141_p2 }
   0x6   : > { %p174_p4 = scmp.lt.s32.totalorder (!%p142_p3), %s509_s9, 3 }
   0x7   : > { %145 = sbr.rel (%p142_p3) target bundleno = 246 (0xf6), region = 28 }
   0xc   : > { %v519_v0 = vmov 0.0   ;;  %vm520_vm0 = vmmov 0   ;;  %s585_s9 = smov (!%p174_p4, %s509_s9), 3 }
   0xd   : > { %440 = vmatprep.subr.bf16.mxu0 %v519_v0  ;;  %456 = vmatprep.mubr.msk.bf16.mxu0 %vm520_vm0, %v519_v0  ;;  %s428_s13 = sshll.u32 %s585_s9, 6  ;;  %s429_s17 = sshll.u32 %s585_s9, 3 }
   0xe   : > { %s181_s16 = scalar_lea.vmem %s577_s0, %s428_s13  ;;  %s186_s20 = scalar_lea.vmem %s578_s1, %s429_s17 }
   0xf   : > { %v486_v1 = vld [vmem:[%s181_s16 + $0x38] sm:$0xff]   ;;  %v487_v2 = vld [vmem:[%s181_s16 + $0x30] sm:$0xff]   ;;  %v488_v3 = vld [vmem:[%s181_s16 + $0x28] sm:$0xff]   ;;  %s430_s21 = sshll.u32 %s585_s9, 4 }
  0x10   : > { %441 = vmatpush3.bf16.msra.mxu0 %v486_v1  ;;  %v489_v4 = vld [vmem:[%s181_s16 + $0x20] sm:$0xff]   ;;  %v490_v5 = vld [vmem:[%s181_s16 + $0x18] sm:$0xff]   ;;  %v491_v6 = vld [vmem:[%s181_s16 + $0x10] sm:$0xff]   ;;  %s194_s24 = scalar_lea.vmem %s579_s2, %s430_s21 }
  0x11   : > { %442 = vmatprep.subr.bf16.mxu0 %v519_v0  ;;  %v492_v7 = vld [vmem:[%s181_s16 + $0x8] sm:$0xff]   ;;  %v493_v8 = vld [vmem:[%s181_s16] sm:$0xff]  }
  0x12   : > { %v494_v9 = vld [vmem:[%s186_s20] sm:$0xff]  }
  0x14   : > { %443 = vmatpush3.bf16.msra.mxu0 %v487_v2 }
  0x15   : > { %444 = vmatprep.subr.bf16.mxu0 %v519_v0 }
  0x18   : > { %445 = vmatpush3.bf16.msra.mxu0 %v488_v3 }
  0x19   : > { %446 = vmatprep.subr.bf16.mxu0 %v519_v0 }
  0x1c   : > { %447 = vmatpush3.bf16.msra.mxu0 %v489_v4 }
  0x1d   : > { %448 = vmatprep.subr.bf16.mxu0 %v519_v0 }
  0x20   : > { %449 = vmatpush3.bf16.msra.mxu0 %v490_v5 }
  0x21   : > { %450 = vmatprep.subr.bf16.mxu0 %v519_v0 }
  0x24   : > { %451 = vmatpush3.bf16.msra.mxu0 %v491_v6 }
  0x25   : > { %452 = vmatprep.subr.bf16.mxu0 %v519_v0 }
  0x28   : > { %453 = vmatpush3.bf16.msra.mxu0 %v492_v7 }
  0x29   : > { %454 = vmatprep.subr.bf16.mxu0 %v519_v0 }
  0x2c   : > { %455 = vmatpush3.bf16.msra.mxu0 %v493_v8 }
  0x2f   : > { %457 = vmatmul.mubr.bf16.vlgmr.msra.gmra.mxu0 %v494_v9 }
  0xef   : > { %v302_v10 = vpop.f32.mrf.mxu0 }
  0xf0   : > { %309 = vst [vmem:[%s194_s24] sm:$0xff] %v302_v10 }
  0xf1   : > { %v458_v11 = vpop.f32.mrf.mxu0 }
  0xf3   : > { %v305_v12 = vpop.f32.mrf.mxu0 }
  0xf4   : > { %310 = vst [vmem:[%s194_s24 + $0x8] sm:$0xff] %v305_v12 }
  0xf5   : > { %v459_v13 = vpop.f32.mrf.mxu0 }
  0xf6 PF: > { %s12_s11 = sadd.s32 1, %s517_s11   ;;  %s580_s9 = smov %s513_s10 }
  0xf7   : > { %p9_p5 = scmp.ge.s32.totalorder %s12_s11, 6   ;;  %s581_s10 = smov %s583_s12 }
  0xf9   :  { %11 = sbr.rel (!%p9_p5) target bundleno = 2 (0x2), region = 61 }

// kernel: generator_forward.14
= control target key start
LH: loop header
LB: loop body
LE: loop exit
PB: predicated region body
PF: predicated region fallthrough
CT: control target
= control target key end

     0   :  { %v165_v28 = vmov 0   ;;  %s282_s0 = inlined_call_operand.vmem [shape: f32[16,512], index: 0, kind: input, shape index: {}]   ;;  %s283_s1 = inlined_call_operand.vmem [shape: f32[16,1], index: 1, kind: input, shape index: {}]   ;;  %s284_s2 = inlined_call_operand.vmem [shape: f32[16,1], index: 2, kind: input, shape index: {}]   ;;  %s285_s3 = inlined_call_operand.vmem [shape: bf16[16,512], index: 3, kind: output, shape index: {}]  }
   0x1   :  { %v189_v0 = vld [vmem:[%s282_s0] sm:$0xff]  ;;  %v194_v1 = vld [vmem:[%s282_s0 + $0x8] sm:$0xff]  ;;  %v199_v2 = vld [vmem:[%s282_s0 + $0x10] sm:$0xff]  ;;  %159 = vset.pattern.permute.xlu0 %v165_v28  ;;  %160 = vset.pattern.permute.xlu1 %v165_v28 }
   0x2   :  { %v204_v3 = vld [vmem:[%s282_s0 + $0x18] sm:$0xff]  ;;  %v22_v4 = vadd.f32 %v194_v1, %v189_v0  ;;  %v34_v5 = vmul.f32 %v189_v0, %v189_v0  ;;  %v35_v6 = vmul.f32 %v194_v1, %v194_v1  ;;  %v36_v7 = vmul.f32 %v199_v2, %v199_v2  ;;  %v217_v8 = vld [vmem:[%s282_s0 + $0x20] sm:$0xff]  ;;  %v222_v9 = vld [vmem:[%s282_s0 + $0x28] sm:$0xff] }
   0x3   :  { %v227_v10 = vld [vmem:[%s282_s0 + $0x30] sm:$0xff]  ;;  %v232_v11 = vld [vmem:[%s282_s0 + $0x38] sm:$0xff]  ;;  %v27_v12 = vadd.f32 %v222_v9, %v217_v8  ;;  %v38_v13 = vmul.f32 %v217_v8, %v217_v8  ;;  %v39_v14 = vmul.f32 %v222_v9, %v222_v9  ;;  %v37_v16 = vmul.f32 %v204_v3, %v204_v3  ;;  %v64_v45 = vld [vmem:[%s283_s1] sm:$0xff] }
   0x4   :  { %v23_v15 = vadd.f32 %v22_v4, %v199_v2  ;;  %v42_v17 = vadd.f32 %v35_v6, %v34_v5  ;;  %v40_v18 = vmul.f32 %v227_v10, %v227_v10  ;;  %v41_v23 = vmul.f32 %v232_v11, %v232_v11  ;;  %v65_v48 = vld [vmem:[%s283_s1 + $0x8] sm:$0xff]  ;;  %v68_v52 = vld [vmem:[%s284_s2] sm:$0xff] }
   0x5   :  { %v28_v19 = vadd.f32 %v27_v12, %v227_v10  ;;  %v47_v20 = vadd.f32 %v39_v14, %v38_v13  ;;  %v69_v55 = vld [vmem:[%s284_s2 + $0x8] sm:$0xff] }
   0x6   :  { %v24_v21 = vadd.f32 %v23_v15, %v204_v3  ;;  %v43_v22 = vadd.f32 %v42_v17, %v36_v7 }
   0x7   :  { %v48_v24 = vadd.f32 %v47_v20, %v40_v18  ;;  %v29_v26 = vadd.f32 %v28_v19, %v232_v11 }
   0x8   :  { %25 = vadd.xlane.f32.xlu0 %v24_v21  ;;  %v44_v25 = vadd.f32 %v43_v22, %v37_v16 }
   0x9   :  { %v49_v27 = vadd.f32 %v48_v24, %v41_v23 }
   0xa   :  { %45 = vadd.xlane.f32.xlu1 %v44_v25 }
   0xc   :  { %30 = vadd.xlane.f32.xlu0 %v29_v26 }
   0xe   :  { %50 = vadd.xlane.f32.xlu1 %v49_v27 }
  0x91   :  { %v26_v29 = vpop.xlane.xlu0 %25 }
  0x92   :  { %v32_v30 = vmul.f32 0.001953125, %v26_v29 }
  0x93   :  { %v46_v31 = vpop.xlane.xlu1 %45 }
  0x94   :  { %v54_v32 = vmul.f32 %v32_v30, %v32_v30  ;;  %v52_v33 = vmul.f32 0.001953125, %v46_v31 }
  0x95   :  { %v31_v34 = vpop.xlane.xlu0 %30 }
  0x96   :  { %v56_v35 = vsub.f32 %v52_v33, %v54_v32  ;;  %v33_v36 = vmul.f32 0.001953125, %v31_v34 }
  0x97   :  { %v51_v37 = vpop.xlane.xlu1 %50 }
  0x98   :  { %v58_v38 = vmax.f32 %v56_v35, 0.0  ;;  %v55_v39 = vmul.f32 %v33_v36, %v33_v36  ;;  %v53_v40 = vmul.f32 0.001953125, %v51_v37 }
  0x9a   :  { %v60_v41 = vadd.f32 1e-05, %v58_v38  ;;  %v57_v42 = vsub.f32 %v53_v40, %v55_v39 }
  0x9c   :  { %161 = vrsqrt.f32 %v60_v41  ;;  %v59_v43 = vmax.f32 %v57_v42, 0.0 }
  0x9e   :  { %v61_v44 = vadd.f32 1e-05, %v59_v43 }
  0xa0   :  { %163 = vrsqrt.f32 %v61_v44 }
  0xa9   :  { %v162_v46 = vpop.eup %161 }
  0xaa   :  { %v66_v47 = vmul.f32 %v162_v46, %v64_v45 }
  0xac   :  { %76 = vperm.xlu0 %159, %v66_v47   ;;  %v70_v51 = vmul.f32 %v66_v47, %v32_v30 }
  0xad   :  { %v164_v49 = vpop.eup %163 }
  0xae   :  { %v67_v50 = vmul.f32 %v164_v49, %v65_v48  ;;  %v72_v53 = vsub.f32 %v68_v52, %v70_v51 }
  0xb0   :  { %81 = vperm.xlu1 %160, %v67_v50   ;;  %v71_v54 = vmul.f32 %v67_v50, %v33_v36 }
  0xb2   :  { %v73_v56 = vsub.f32 %v69_v55, %v71_v54 }
  0xb4   :  { %94 = vperm.xlu1 %160, %v72_v53  }
  0xb8   :  { %99 = vperm.xlu1 %160, %v73_v56  }
 0x127   :  { %v77_v57 = vpop.permute.xlu0 %76 }
 0x128   :  { %v84_v59 = vmul.f32 %v77_v57, %v189_v0  ;;  %v85_v60 = vmul.f32 %v77_v57, %v194_v1  ;;  %v86_v61 = vmul.f32 %v77_v57, %v199_v2  ;;  %v87_v62 = vmul.f32 %v77_v57, %v204_v3 }
 0x12b   :  { %v82_v58 = vpop.permute.xlu1 %81 }
 0x12c   :  { %v88_v12 = vmul.f32 %v82_v58, %v217_v8  ;;  %v89_v13 = vmul.f32 %v82_v58, %v222_v9  ;;  %v90_v0 = vmul.f32 %v82_v58, %v227_v10  ;;  %v91_v1 = vmul.f32 %v82_v58, %v232_v11 }
 0x12f   :  { %v95_v63 = vpop.permute.xlu1 %94 }
 0x130   :  { %v102_v4 = vadd.f32 %v95_v63, %v84_v59  ;;  %v103_v5 = vadd.f32 %v95_v63, %v85_v60  ;;  %v104_v6 = vadd.f32 %v95_v63, %v86_v61  ;;  %v105_v7 = vadd.f32 %v95_v63, %v87_v62 }
 0x132   :  { %v110_v14 = vmax.f32 %v102_v4, 0.0  ;;  %v111_v15 = vmax.f32 %v103_v5, 0.0  ;;  %v112_v16 = vmax.f32 %v104_v6, 0.0  ;;  %v113_v17 = vmax.f32 %v105_v7, 0.0 }
 0x133   :  { %v100_v2 = vpop.permute.xlu1 %99 }
 0x134   :  { %v154_v18 = vpack.c.bf16 %v111_v15, %v110_v14  ;;  %v155_v3 = vpack.c.bf16 %v113_v17, %v112_v16  ;;  %v106_v19 = vadd.f32 %v100_v2, %v88_v12  ;;  %v107_v20 = vadd.f32 %v100_v2, %v89_v13 }
 0x135   :  { %v108_v21 = vadd.f32 %v100_v2, %v90_v0  ;;  %v109_v22 = vadd.f32 %v100_v2, %v91_v1 }
 0x136   :  { %142 = vst [vmem:[%s285_s3] sm:$0xff] %v154_v18  ;;  %143 = vst [vmem:[%s285_s3 + $0x8] sm:$0xff] %v155_v3  ;;  %v114_v8 = vmax.f32 %v106_v19, 0.0  ;;  %v115_v9 = vmax.f32 %v107_v20, 0.0 }
 0x137   :  { %v116_v10 = vmax.f32 %v108_v21, 0.0  ;;  %v117_v23 = vmax.f32 %v109_v22, 0.0 }
 0x138   :  { %v156_v11 = vpack.c.bf16 %v115_v9, %v114_v8 }
 0x139   :  { %v157_v24 = vpack.c.bf16 %v117_v23, %v116_v10 }
 0x13a   :  { %144 = vst [vmem:[%s285_s3 + $0x10] sm:$0xff] %v156_v11 }
 0x13b   :  { %145 = vst [vmem:[%s285_s3 + $0x18] sm:$0xff] %v157_v24 }

// kernel: generator_forward.15
= control target key start
LH: loop header
LB: loop body
LE: loop exit
PB: predicated region body
PF: predicated region fallthrough
CT: control target
= control target key end

     0   :  { %s608_s9 = smov 0   ;;  %s610_s10 = smov 0   ;;  %s649_s0 = inlined_call_operand.vmem [shape: bf16[4,64,512], index: 0, kind: input, shape index: {}]   ;;  %s650_s1 = inlined_call_operand.vmem [shape: bf16[4,8,64], index: 1, kind: input, shape index: {}]   ;;  %s651_s2 = inlined_call_operand.vmem [shape: f32[4,8,512], index: 2, kind: output, shape index: {}]  }
   0x1   :  { %s612_s11 = smov 0  }
   0x2 LB: > { %s24_s12 = sadd.s32 1, %s586_s10  ;;  %p491_p0 = scmp.ge.s32.totalorder %s590_s11, 1  ;;  %s590_s11 = sphi %s612_s11, %s12_s11   ;;  %s586_s10 = sphi %s610_s10, %s653_s10   ;;  %s582_s9 = sphi %s608_s9, %s652_s9  }
   0x3   : > { %p26_p1 = scmp.ge.s32.totalorder %s24_s12, 4  ;;  %p142_p2 = scmp.lt.s32.totalorder %s590_s11, 5 }
   0x5   : > { %s655_s12 = smov (%p26_p1, %s24_s12), 0  ;;  %p143_p3 = pnand %p491_p0, %p142_p2 }
   0x6   : > { %p177_p4 = scmp.lt.s32.totalorder (!%p143_p3), %s582_s9, 3 }
   0x7   : > { %146 = sbr.rel (%p143_p3) target bundleno = 231 (0xe7), region = 28 }
   0xc   : > { %v592_v0 = vmov 0   ;;  %s657_s9 = smov (!%p177_p4, %s582_s9), 3  ;;  %vm298_vm0 = vcmask 523264  }
   0xd   : > { %334 = vmatprep.mubr.bf16.mxu0 %v592_v0  ;;  %375 = vmatprep.mubr.bf16.mxu1 %v592_v0  ;;  %s517_s13 = sshll.u32 %s657_s9, 7  ;;  %s494_s17 = sshll.u32 %s657_s9, 2 }
   0xe   : > { %s184_s16 = scalar_lea.vmem %s649_s0, %s517_s13  ;;  %s189_s20 = scalar_lea.vmem %s650_s1, %s494_s17 }
   0xf   : > { %v544_v1 = vld [vmem:[%s184_s16 + $0x64] ss:$16 sps:$4 sm:$0xff]   ;;  %v546_v2 = vld [vmem:[%s184_s16 + $0x6c] ss:$16 sps:$4 sm:$0xff]   ;;  %v548_v3 = vld [vmem:[%s184_s16 + $0x60] ss:$16 sps:$4 sm:$0xff]  }
  0x10   : > { %310 = vmatprep.subr.bf16.mxu0 %v544_v1  ;;  %v549_v4 = vld [vmem:[%s184_s16 + $0x68] ss:$16 sps:$4 sm:$0xff]   ;;  %351 = vmatprep.subr.bf16.mxu1 %v546_v2  ;;  %v550_v5 = vld [vmem:[%s184_s16 + $0x44] ss:$16 sps:$4 sm:$0xff]   ;;  %v552_v6 = vld [vmem:[%s184_s16 + $0x4c] ss:$16 sps:$4 sm:$0xff]  }
  0x11   : > { %311 = vmatpush1.bf16.msra.mxu0 %v548_v3  ;;  %352 = vmatpush1.bf16.msra.mxu1 %v549_v4  ;;  %v554_v7 = vld [vmem:[%s184_s16 + $0x40] ss:$16 sps:$4 sm:$0xff]   ;;  %v555_v8 = vld [vmem:[%s184_s16 + $0x48] ss:$16 sps:$4 sm:$0xff]   ;;  %v556_v9 = vld [vmem:[%s184_s16 + $0x24] ss:$16 sps:$4 sm:$0xff]  }
  0x12   : > { %312 = vmatprep.subr.bf16.mxu0 %v550_v5  ;;  %353 = vmatprep.subr.bf16.mxu1 %v552_v6  ;;  %v558_v10 = vld [vmem:[%s184_s16 + $0x2c] ss:$16 sps:$4 sm:$0xff]   ;;  %v560_v11 = vld [vmem:[%s184_s16 + $0x20] ss:$16 sps:$4 sm:$0xff]   ;;  %v561_v12 = vld [vmem:[%s184_s16 + $0x28] ss:$16 sps:$4 sm:$0xff]  }
  0x13   : > { %v562_v13 = vld [vmem:[%s184_s16 + $0x4] ss:$16 sps:$4 sm:$0xff]   ;;  %v564_v14 = vld [vmem:[%s184_s16 + $0xc] ss:$16 sps:$4 sm:$0xff]   ;;  %v566_v15 = vld [vmem:[%s184_s16] ss:$16 sps:$4 sm:$0xff]  }
  0x14   : > { %v567_v16 = vld [vmem:[%s184_s16 + $0x8] ss:$16 sps:$4 sm:$0xff]   ;;  %v201_v17 = vld [vmem:[%s189_s20] sm:$0xf]  ;;  %s518_s21 = sshll.u32 %s657_s9, 5 }
  0x15   : > { %313 = vmatpush1.bf16.msra.mxu0 %v554_v7  ;;  %354 = vmatpush1.bf16.msra.mxu1 %v555_v8  ;;  %s198_s24 = scalar_lea.vmem %s651_s2, %s518_s21 }
  0x16   : > { %314 = vmatprep.subr.bf16.mxu0 %v556_v9  ;;  %355 = vmatprep.subr.bf16.mxu1 %v558_v10 }
  0x19   : > { %315 = vmatpush1.bf16.msra.mxu0 %v560_v11  ;;  %356 = vmatpush1.bf16.msra.mxu1 %v561_v12 }
  0x1a   : > { %316 = vmatprep.subr.bf16.mxu0 %v562_v13  ;;  %357 = vmatprep.subr.bf16.mxu1 %v564_v14 }
  0x1d   : > { %317 = vmatpush1.bf16.msra.mxu0 %v566_v15  ;;  %358 = vmatpush1.bf16.msra.mxu1 %v567_v16 }
  0x20   : > { %513 = vmatmul.mubr.msk.bf16.vlgmr.msra.gmra.mxu0 %vm298_vm0, %v201_v17  ;;  %514 = vmatmul.mubr.msk.bf16.vlgmr.msra.gmra.mxu1 %vm298_vm0, %v201_v17 }
  0xe0   : > { %v336_v18 = vpop.f32.mrf.mxu0  ;;  %v377_v19 = vpop.f32.mrf.mxu1 }
  0xe1   : > { %384 = vst [vmem:[%s198_s24] sm:$0xff] %v336_v18  ;;  %386 = vst [vmem:[%s198_s24 + $0x10] sm:$0xff] %v377_v19 }
  0xe2   : > { %v338_v20 = vpop.f32.mrf.mxu0  ;;  %v379_v21 = vpop.f32.mrf.mxu1 }
  0xe3   : > { %385 = vst [vmem:[%s198_s24 + $0x8] sm:$0xff] %v338_v20  ;;  %387 = vst [vmem:[%s198_s24 + $0x18] sm:$0xff] %v379_v21 }
  0xe4   : > { %v340_v22 = vpop.f32.mrf.mxu0  ;;  %v381_v23 = vpop.f32.mrf.mxu1 }
  0xe6   : > { %v341_v24 = vpop.f32.mrf.mxu0  ;;  %v382_v25 = vpop.f32.mrf.mxu1 }
  0xe7 PF: > { %s12_s11 = sadd.s32 1, %s590_s11   ;;  %s652_s9 = smov %s586_s10 }
  0xe8   : > { %p9_p5 = scmp.ge.s32.totalorder %s12_s11, 6   ;;  %s653_s10 = smov %s655_s12 }
  0xea   :  { %11 = sbr.rel (!%p9_p5) target bundleno = 2 (0x2), region = 61 }

// kernel: generator_forward.16
= control target key start
LH: loop header
LB: loop body
LE: loop exit
PB: predicated region body
PF: predicated region fallthrough
CT: control target
= control target key end

     0   :  { %v247_v62 = vmov 0   ;;  %s412_s0 = inlined_call_operand.vmem [shape: f32[8,2048], index: 0, kind: input, shape index: {}]   ;;  %s413_s1 = inlined_call_operand.vmem [shape: f32[8,1], index: 1, kind: input, shape index: {}]   ;;  %s414_s2 = inlined_call_operand.vmem [shape: f32[8,1], index: 2, kind: input, shape index: {}]   ;;  %s415_s3 = inlined_call_operand.vmem [shape: bf16[8,2048], index: 3, kind: output, shape index: {}]  }
   0x1   :  { %v271_v0 = vld [vmem:[%s412_s0] sm:$0xff]  ;;  %v276_v1 = vld [vmem:[%s412_s0 + $0x8] sm:$0xff]  ;;  %v281_v2 = vld [vmem:[%s412_s0 + $0x10] sm:$0xff]  ;;  %243 = vset.pattern.permute.xlu1 %v247_v62  ;;  %244 = vset.pattern.permute.xlu0 %v247_v62 }
   0x2   :  { %v30_v3 = vadd.f32 %v276_v1, %v271_v0  ;;  %v48_v4 = vmul.f32 %v271_v0, %v271_v0  ;;  %v49_v5 = vmul.f32 %v276_v1, %v276_v1  ;;  %v292_v6 = vld [vmem:[%s412_s0 + $0x18] sm:$0xff]  ;;  %v50_v7 = vmul.f32 %v281_v2, %v281_v2  ;;  %v300_v9 = vld [vmem:[%s412_s0 + $0x20] sm:$0xff]  ;;  %v308_v13 = vld [vmem:[%s412_s0 + $0x28] sm:$0xff] }
   0x3   :  { %v51_v10 = vmul.f32 %v292_v6, %v292_v6  ;;  %v52_v14 = vmul.f32 %v300_v9, %v300_v9  ;;  %v316_v17 = vld [vmem:[%s412_s0 + $0x30] sm:$0xff]  ;;  %v53_v18 = vmul.f32 %v308_v13, %v308_v13  ;;  %v324_v21 = vld [vmem:[%s412_s0 + $0x38] sm:$0xff]  ;;  %v332_v25 = vld [vmem:[%s412_s0 + $0x40] sm:$0xff] }
   0x4   :  { %v31_v8 = vadd.f32 %v30_v3, %v281_v2  ;;  %v64_v11 = vadd.f32 %v49_v5, %v48_v4  ;;  %v54_v22 = vmul.f32 %v316_v17, %v316_v17  ;;  %v55_v26 = vmul.f32 %v324_v21, %v324_v21  ;;  %v340_v29 = vld [vmem:[%s412_s0 + $0x48] sm:$0xff]  ;;  %v348_v33 = vld [vmem:[%s412_s0 + $0x50] sm:$0xff]  ;;  %v25_v37 = vld [vmem:[%s412_s0 + $0x58] sm:$0xff] }
   0x5   :  { %v56_v30 = vmul.f32 %v332_v25, %v332_v25  ;;  %v57_v34 = vmul.f32 %v340_v29, %v340_v29  ;;  %v58_v38 = vmul.f32 %v348_v33, %v348_v33  ;;  %v26_v41 = vld [vmem:[%s412_s0 + $0x60] sm:$0xff]  ;;  %v59_v42 = vmul.f32 %v25_v37, %v25_v37  ;;  %v27_v45 = vld [vmem:[%s412_s0 + $0x68] sm:$0xff]  ;;  %v28_v49 = vld [vmem:[%s412_s0 + $0x70] sm:$0xff] }
   0x6   :  { %v32_v12 = vadd.f32 %v31_v8, %v292_v6  ;;  %v65_v15 = vadd.f32 %v64_v11, %v50_v7  ;;  %v60_v46 = vmul.f32 %v26_v41, %v26_v41  ;;  %v61_v50 = vmul.f32 %v27_v45, %v27_v45  ;;  %v29_v53 = vld [vmem:[%s412_s0 + $0x78] sm:$0xff] }
   0x7   :  { %v62_v54 = vmul.f32 %v28_v49, %v28_v49  ;;  %v63_v57 = vmul.f32 %v29_v53, %v29_v53 }
   0x8   :  { %v33_v16 = vadd.f32 %v32_v12, %v300_v9  ;;  %v66_v19 = vadd.f32 %v65_v15, %v51_v10  ;;  %v87_v12 = vld [vmem:[%s413_s1] sm:$0xff] }
   0xa   :  { %v34_v20 = vadd.f32 %v33_v16, %v308_v13  ;;  %v67_v23 = vadd.f32 %v66_v19, %v52_v14  ;;  %v89_v16 = vld [vmem:[%s414_s2] sm:$0xff] }
   0xc   :  { %v35_v24 = vadd.f32 %v34_v20, %v316_v17  ;;  %v68_v27 = vadd.f32 %v67_v23, %v53_v18 }
   0xe   :  { %v36_v28 = vadd.f32 %v35_v24, %v324_v21  ;;  %v69_v31 = vadd.f32 %v68_v27, %v54_v22 }
  0x10   :  { %v37_v32 = vadd.f32 %v36_v28, %v332_v25  ;;  %v70_v35 = vadd.f32 %v69_v31, %v55_v26 }
  0x12   :  { %v38_v36 = vadd.f32 %v37_v32, %v340_v29  ;;  %v71_v39 = vadd.f32 %v70_v35, %v56_v30 }
  0x14   :  { %v39_v40 = vadd.f32 %v38_v36, %v348_v33  ;;  %v72_v43 = vadd.f32 %v71_v39, %v57_v34 }
  0x16   :  { %v40_v44 = vadd.f32 %v39_v40, %v25_v37  ;;  %v73_v47 = vadd.f32 %v72_v43, %v58_v38 }
  0x18   :  { %v41_v48 = vadd.f32 %v40_v44, %v26_v41  ;;  %v74_v51 = vadd.f32 %v73_v47, %v59_v42 }
  0x1a   :  { %v42_v52 = vadd.f32 %v41_v48, %v27_v45  ;;  %v75_v55 = vadd.f32 %v74_v51, %v60_v46 }
  0x1c   :  { %v43_v56 = vadd.f32 %v42_v52, %v28_v49  ;;  %v76_v58 = vadd.f32 %v75_v55, %v61_v50 }
  0x1e   :  { %v44_v59 = vadd.f32 %v43_v56, %v29_v53  ;;  %v77_v60 = vadd.f32 %v76_v58, %v62_v54 }
  0x20   :  { %45 = vadd.xlane.f32.xlu0 %v44_v59  ;;  %v78_v61 = vadd.f32 %v77_v60, %v63_v57 }
  0x24   :  { %79 = vadd.xlane.f32.xlu0 %v78_v61 }
  0xa9   :  { %v46_v63 = vpop.xlane.xlu0 %45 }
  0xaa   :  { %v47_v3 = vmul.f32 0.00048828125, %v46_v63 }
  0xac   :  { %v82_v5 = vmul.f32 %v47_v3, %v47_v3 }
  0xad   :  { %v80_v4 = vpop.xlane.xlu0 %79 }
  0xae   :  { %v81_v7 = vmul.f32 0.00048828125, %v80_v4 }
  0xb0   :  { %v83_v8 = vsub.f32 %v81_v7, %v82_v5 }
  0xb2   :  { %v84_v10 = vmax.f32 %v83_v8, 0.0 }
  0xb4   :  { %v85_v11 = vadd.f32 1e-05, %v84_v10 }
  0xb6   :  { %245 = vrsqrt.f32 %v85_v11 }
  0xc3   :  { %v246_v14 = vpop.eup %245 }
  0xc4   :  { %v88_v15 = vmul.f32 %v246_v14, %v87_v12 }
  0xc6   :  { %94 = vperm.xlu1 %243, %v88_v15   ;;  %v90_v18 = vmul.f32 %v88_v15, %v47_v3 }
  0xc8   :  { %v91_v19 = vsub.f32 %v89_v16, %v90_v18 }
  0xca   :  { %115 = vperm.xlu1 %243, %v91_v19  }
 0x141   :  { %v95_v20 = vpop.permute.xlu1 %94 }
 0x142   :  { %v97_v22 = vmul.f32 %v95_v20, %v271_v0  ;;  %v98_v23 = vmul.f32 %v95_v20, %v276_v1  ;;  %v99_v24 = vmul.f32 %v95_v20, %v281_v2  ;;  %v100_v26 = vmul.f32 %v95_v20, %v292_v6 }
 0x143   :  { %v101_v27 = vmul.f32 %v95_v20, %v300_v9  ;;  %v102_v28 = vmul.f32 %v95_v20, %v308_v13  ;;  %v103_v30 = vmul.f32 %v95_v20, %v316_v17  ;;  %v104_v31 = vmul.f32 %v95_v20, %v324_v21 }
 0x144   :  { %v105_v32 = vmul.f32 %v95_v20, %v332_v25  ;;  %v106_v34 = vmul.f32 %v95_v20, %v340_v29  ;;  %v107_v0 = vmul.f32 %v95_v20, %v348_v33  ;;  %v108_v35 = vmul.f32 %v95_v20, %v25_v37 }
 0x145   :  { %v109_v1 = vmul.f32 %v95_v20, %v26_v41  ;;  %v110_v36 = vmul.f32 %v95_v20, %v27_v45  ;;  %v111_v2 = vmul.f32 %v95_v20, %v28_v49  ;;  %v112_v38 = vmul.f32 %v95_v20, %v29_v53  ;;  %v116_v6 = vpop.permute.xlu1 %115 }
 0x146   :  { %v118_v39 = vadd.f32 %v116_v6, %v97_v22  ;;  %v119_v9 = vadd.f32 %v116_v6, %v98_v23  ;;  %v120_v40 = vadd.f32 %v116_v6, %v99_v24  ;;  %v121_v13 = vadd.f32 %v116_v6, %v100_v26 }
 0x147   :  { %v122_v42 = vadd.f32 %v116_v6, %v101_v27  ;;  %v123_v17 = vadd.f32 %v116_v6, %v102_v28  ;;  %v124_v43 = vadd.f32 %v116_v6, %v103_v30  ;;  %v125_v21 = vadd.f32 %v116_v6, %v104_v31 }
 0x148   :  { %v126_v44 = vadd.f32 %v116_v6, %v105_v32  ;;  %v127_v25 = vadd.f32 %v116_v6, %v106_v34  ;;  %v128_v46 = vadd.f32 %v116_v6, %v107_v0  ;;  %v129_v29 = vadd.f32 %v116_v6, %v108_v35 }
 0x149   :  { %v130_v47 = vadd.f32 %v116_v6, %v109_v1  ;;  %v131_v33 = vadd.f32 %v116_v6, %v110_v36  ;;  %v132_v37 = vadd.f32 %v116_v6, %v111_v2  ;;  %v133_v41 = vadd.f32 %v116_v6, %v112_v38 }
 0x14a   :  { %v134_v45 = vmax.f32 %v118_v39, 0.0  ;;  %v135_v48 = vmax.f32 %v119_v9, 0.0  ;;  %v136_v49 = vmax.f32 %v120_v40, 0.0  ;;  %v137_v50 = vmax.f32 %v121_v13, 0.0 }
 0x14b   :  { %v138_v51 = vmax.f32 %v122_v42, 0.0  ;;  %v139_v52 = vmax.f32 %v123_v17, 0.0  ;;  %v140_v53 = vmax.f32 %v124_v43, 0.0  ;;  %v141_v54 = vmax.f32 %v125_v21, 0.0 }
 0x14c   :  { %v142_v55 = vmax.f32 %v126_v44, 0.0  ;;  %v143_v56 = vmax.f32 %v127_v25, 0.0  ;;  %v144_v57 = vmax.f32 %v128_v46, 0.0  ;;  %v145_v58 = vmax.f32 %v129_v29, 0.0 }
 0x14d   :  { %v146_v59 = vmax.f32 %v130_v47, 0.0  ;;  %v147_v60 = vmax.f32 %v131_v33, 0.0  ;;  %v148_v61 = vmax.f32 %v132_v37, 0.0  ;;  %v149_v62 = vmax.f32 %v133_v41, 0.0 }
 0x14e   :  { %v234_v63 = vpack.c.bf16 %v135_v48, %v134_v45  ;;  %v235_v3 = vpack.c.bf16 %v137_v50, %v136_v49  ;;  %v236_v4 = vpack.c.bf16 %v139_v52, %v138_v51  ;;  %v237_v5 = vpack.c.bf16 %v141_v54, %v140_v53 }
 0x14f   :  { %v238_v7 = vpack.c.bf16 %v143_v56, %v142_v55  ;;  %v239_v8 = vpack.c.bf16 %v145_v58, %v144_v57  ;;  %v240_v10 = vpack.c.bf16 %v147_v60, %v146_v59  ;;  %v241_v11 = vpack.c.bf16 %v149_v62, %v148_v61 }
 0x150   :  { %214 = vst [vmem:[%s415_s3] sm:$0xff] %v234_v63  ;;  %215 = vst [vmem:[%s415_s3 + $0x8] sm:$0xff] %v235_v3 }
 0x151   :  { %216 = vst [vmem:[%s415_s3 + $0x10] sm:$0xff] %v236_v4  ;;  %217 = vst [vmem:[%s415_s3 + $0x18] sm:$0xff] %v237_v5 }
 0x152   :  { %218 = vst [vmem:[%s415_s3 + $0x20] sm:$0xff] %v238_v7  ;;  %219 = vst [vmem:[%s415_s3 + $0x28] sm:$0xff] %v239_v8 }
 0x153   :  { %220 = vst [vmem:[%s415_s3 + $0x30] sm:$0xff] %v240_v10  ;;  %221 = vst [vmem:[%s415_s3 + $0x38] sm:$0xff] %v241_v11 }

// kernel: generator_forward.17
= control target key start
LH: loop header
LB: loop body
LE: loop exit
PB: predicated region body
PF: predicated region fallthrough
CT: control target
= control target key end

     0   :  { %s1095_s9 = smov 0   ;;  %s1097_s10 = smov 0   ;;  %s1196_s0 = inlined_call_operand.vmem [shape: bf16[4,32,2048], index: 0, kind: input, shape index: {}]   ;;  %s1197_s1 = inlined_call_operand.vmem [shape: bf16[4,1,32], index: 1, kind: input, shape index: {}]   ;;  %s1198_s2 = inlined_call_operand.vmem [shape: f32[4,1,2048], index: 2, kind: output, shape index: {}]  }
   0x1   :  { %s1099_s11 = smov 0  }
   0x2 LB: > { %s24_s12 = sadd.s32 1, %s1072_s10  ;;  %p949_p0 = scmp.ge.s32.totalorder %s1076_s11, 1  ;;  %s1076_s11 = sphi %s1099_s11, %s12_s11   ;;  %s1072_s10 = sphi %s1097_s10, %s1200_s10   ;;  %s1068_s9 = sphi %s1095_s9, %s1199_s9  }
   0x3   : > { %p26_p1 = scmp.ge.s32.totalorder %s24_s12, 4  ;;  %p141_p2 = scmp.lt.s32.totalorder %s1076_s11, 5 }
   0x5   : > { %s1202_s12 = smov (%p26_p1, %s24_s12), 0  ;;  %p142_p3 = pnand %p949_p0, %p141_p2 }
   0x6   : > { %p174_p4 = scmp.lt.s32.totalorder (!%p142_p3), %s1068_s9, 3 }
   0x7   : > { %145 = sbr.rel (%p142_p3) target bundleno = 272 (0x110), region = 28 }
   0xc   : > { %v1078_v0 = vmov 0   ;;  %s1204_s9 = smov (!%p174_p4, %s1068_s9), 3  ;;  %vm389_vm0 = vcmask 261120  }
   0xd   : > { %425 = vmatprep.mubr.bf16.mxu0 %v1078_v0  ;;  %466 = vmatprep.mubr.bf16.mxu1 %v1078_v0  ;;  %s995_s13 = sshll.u32 %s1204_s9, 8  ;;  %s185_s19 = scalar_lea.vmem %s1197_s1, %s1204_s9 }
   0xe   : > { %s1121_s16 = scalar_lea.vmem %s1196_s0, %s995_s13  ;;  %v1143_v27 = vld [vmem:[%s185_s19] sm:$0x1]  ;;  %s952_s20 = sshll.u32 %s1204_s9, 4 }
   0xf   : > { %v213_v1 = vld [vmem:[%s1121_s16 + $0x80] sm:$0xff]  ;;  %v214_v3 = vld [vmem:[%s1121_s16 + $0x88] sm:$0xff]  ;;  %v215_v14 = vld [vmem:[%s1121_s16 + $0x90] sm:$0xff]  ;;  %s193_s23 = scalar_lea.vmem %s1198_s2, %s952_s20 }
  0x10   : > { %v221_v2 = vld [vmem:[%s1121_s16 + $0xc0] sm:$0xff]  ;;  %v222_v5 = vld [vmem:[%s1121_s16 + $0xc8] sm:$0xff]  ;;  %v223_v16 = vld [vmem:[%s1121_s16 + $0xd0] sm:$0xff] }
  0x11   : > { %v970_v4 = vcombine.high %v213_v1, %v221_v2  ;;  %v969_v6 = vcombine.low %v213_v1, %v221_v2  ;;  %v197_v7 = vld [vmem:[%s1121_s16] sm:$0xff]  ;;  %v972_v9 = vcombine.high %v214_v3, %v222_v5  ;;  %v971_v10 = vcombine.low %v214_v3, %v222_v5  ;;  %v198_v12 = vld [vmem:[%s1121_s16 + $0x8] sm:$0xff]  ;;  %v216_v17 = vld [vmem:[%s1121_s16 + $0x98] sm:$0xff] }
  0x12   : > { %v205_v8 = vld [vmem:[%s1121_s16 + $0x40] sm:$0xff]  ;;  %v206_v13 = vld [vmem:[%s1121_s16 + $0x48] sm:$0xff]  ;;  %v224_v18 = vld [vmem:[%s1121_s16 + $0xd8] sm:$0xff]  ;;  %v974_v21 = vcombine.high %v215_v14, %v223_v16  ;;  %v973_v28 = vcombine.low %v215_v14, %v223_v16  ;;  %v1079_v14 = vmov 1966171168   ;;  %v760_v16 = vlaneseq }
  0x13   : > { %v954_v11 = vcombine.high %v197_v7, %v205_v8  ;;  %405 = vmatprep.subr.bf16.mxu0 %v970_v4  ;;  %v956_v15 = vcombine.high %v198_v12, %v206_v13  ;;  %446 = vmatprep.subr.bf16.mxu1 %v972_v9  ;;  %v953_v19 = vcombine.low %v197_v7, %v205_v8  ;;  %v199_v23 = vld [vmem:[%s1121_s16 + $0x10] sm:$0xff]  ;;  %v200_v25 = vld [vmem:[%s1121_s16 + $0x18] sm:$0xff]  ;;  %v217_v32 = vld [vmem:[%s1121_s16 + $0xa0] sm:$0xff] }
  0x14   : > { %406 = vmatpush1.bf16.msra.mxu0 %v969_v6  ;;  %447 = vmatpush1.bf16.msra.mxu1 %v971_v10  ;;  %v955_v20 = vcombine.low %v198_v12, %v206_v13  ;;  %v976_v22 = vcombine.high %v216_v17, %v224_v18  ;;  %v207_v24 = vld [vmem:[%s1121_s16 + $0x50] sm:$0xff]  ;;  %v208_v26 = vld [vmem:[%s1121_s16 + $0x58] sm:$0xff]  ;;  %v975_v29 = vcombine.low %v216_v17, %v224_v18  ;;  %v225_v33 = vld [vmem:[%s1121_s16 + $0xe0] sm:$0xff] }
  0x15   : > { %407 = vmatprep.subr.bf16.mxu0 %v954_v11  ;;  %448 = vmatprep.subr.bf16.mxu1 %v956_v15  ;;  %v958_v30 = vcombine.high %v199_v23, %v207_v24  ;;  %v960_v31 = vcombine.high %v200_v25, %v208_v26  ;;  %v218_v34 = vld [vmem:[%s1121_s16 + $0xa8] sm:$0xff]  ;;  %v957_v36 = vcombine.low %v199_v23, %v207_v24  ;;  %v201_v40 = vld [vmem:[%s1121_s16 + $0x20] sm:$0xff]  ;;  %v219_v48 = vld [vmem:[%s1121_s16 + $0xb0] sm:$0xff]  ;;  %v758_v15 = vunpack.c.l.s4 %v1079_v14 }
  0x16   : > { %v226_v35 = vld [vmem:[%s1121_s16 + $0xe8] sm:$0xff]  ;;  %v959_v37 = vcombine.low %v200_v25, %v208_v26  ;;  %v978_v38 = vcombine.high %v217_v32, %v225_v33  ;;  %v209_v41 = vld [vmem:[%s1121_s16 + $0x60] sm:$0xff]  ;;  %v977_v44 = vcombine.low %v217_v32, %v225_v33  ;;  %v227_v49 = vld [vmem:[%s1121_s16 + $0xf0] sm:$0xff]  ;;  %v761_v23 = vshrl.u32 %v760_v16, 7 }
  0x17   : > { %v980_v39 = vcombine.high %v218_v34, %v226_v35  ;;  %v202_v42 = vld [vmem:[%s1121_s16 + $0x28] sm:$0xff]  ;;  %v979_v45 = vcombine.low %v218_v34, %v226_v35  ;;  %v962_v46 = vcombine.high %v201_v40, %v209_v41  ;;  %v220_v50 = vld [vmem:[%s1121_s16 + $0xb8] sm:$0xff]  ;;  %v961_v52 = vcombine.low %v201_v40, %v209_v41  ;;  %v203_v56 = vld [vmem:[%s1121_s16 + $0x30] sm:$0xff] }
  0x18   : > { %408 = vmatpush1.bf16.msra.mxu0 %v953_v19  ;;  %449 = vmatpush1.bf16.msra.mxu1 %v955_v20  ;;  %v210_v43 = vld [vmem:[%s1121_s16 + $0x68] sm:$0xff]  ;;  %v228_v51 = vld [vmem:[%s1121_s16 + $0xf8] sm:$0xff]  ;;  %v982_v54 = vcombine.high %v219_v48, %v227_v49  ;;  %v211_v57 = vld [vmem:[%s1121_s16 + $0x70] sm:$0xff]  ;;  %v981_v60 = vcombine.low %v219_v48, %v227_v49 }
  0x19   : > { %487 = vmatprep.subr.bf16.mxu0 %v974_v21  ;;  %528 = vmatprep.subr.bf16.mxu1 %v976_v22  ;;  %v964_v47 = vcombine.high %v202_v42, %v210_v43  ;;  %v963_v53 = vcombine.low %v202_v42, %v210_v43  ;;  %v984_v55 = vcombine.high %v220_v50, %v228_v51  ;;  %v204_v58 = vld [vmem:[%s1121_s16 + $0x38] sm:$0xff]  ;;  %v759_v22 = vunpack.c.0.s8 %v758_v15 }
  0x1a   : > { %v212_v59 = vld [vmem:[%s1121_s16 + $0x78] sm:$0xff]  ;;  %v983_v61 = vcombine.low %v220_v50, %v228_v51  ;;  %v966_v62 = vcombine.high %v203_v56, %v211_v57  ;;  %v965_v1 = vcombine.low %v203_v56, %v211_v57 }
  0x1b   : > { %985 = vmatmul.mubr.msk.bf16.vlgmr.msra.gmra.mxu0 %vm389_vm0, %v1143_v27  ;;  %986 = vmatmul.mubr.msk.bf16.vlgmr.msra.gmra.mxu1 %vm389_vm0, %v1143_v27  ;;  %v968_v63 = vcombine.high %v204_v58, %v212_v59  ;;  %v967_v2 = vcombine.low %v204_v58, %v212_v59  ;;  %v762_v32 = vsub.s32 %v759_v22, %v761_v23 }
  0x1c   : > { %488 = vmatpush1.bf16.msra.mxu0 %v973_v28  ;;  %529 = vmatpush1.bf16.msra.mxu1 %v975_v29 }
  0x1d   : > { %489 = vmatprep.subr.bf16.mxu0 %v958_v30  ;;  %530 = vmatprep.subr.bf16.mxu1 %v960_v31 }
  0x1e   : > { %507 = vmatprep.mubr.bf16.mxu0 %v1078_v0  ;;  %548 = vmatprep.mubr.bf16.mxu1 %v1078_v0 }
  0x20   : > { %490 = vmatpush1.bf16.msra.mxu0 %v957_v36  ;;  %531 = vmatpush1.bf16.msra.mxu1 %v959_v37 }
  0x21   : > { %569 = vmatprep.subr.bf16.mxu0 %v978_v38  ;;  %610 = vmatprep.subr.bf16.mxu1 %v980_v39 }
  0x23   : > { %987 = vmatmul.mubr.msk.bf16.vlgmr.msra.gmra.mxu0 %vm389_vm0, %v1143_v27  ;;  %988 = vmatmul.mubr.msk.bf16.vlgmr.msra.gmra.mxu1 %vm389_vm0, %v1143_v27 }
  0x24   : > { %570 = vmatpush1.bf16.msra.mxu0 %v977_v44  ;;  %611 = vmatpush1.bf16.msra.mxu1 %v979_v45 }
  0x25   : > { %571 = vmatprep.subr.bf16.mxu0 %v962_v46  ;;  %612 = vmatprep.subr.bf16.mxu1 %v964_v47 }
  0x26   : > { %589 = vmatprep.mubr.bf16.mxu0 %v1078_v0  ;;  %630 = vmatprep.mubr.bf16.mxu1 %v1078_v0 }
  0x28   : > { %572 = vmatpush1.bf16.msra.mxu0 %v961_v52  ;;  %613 = vmatpush1.bf16.msra.mxu1 %v963_v53 }
  0x29   : > { %651 = vmatprep.subr.bf16.mxu0 %v982_v54  ;;  %692 = vmatprep.subr.bf16.mxu1 %v984_v55 }
  0x2b   : > { %989 = vmatmul.mubr.msk.bf16.vlgmr.msra.gmra.mxu0 %vm389_vm0, %v1143_v27  ;;  %990 = vmatmul.mubr.msk.bf16.vlgmr.msra.gmra.mxu1 %vm389_vm0, %v1143_v27 }
  0x2c   : > { %652 = vmatpush1.bf16.msra.mxu0 %v981_v60  ;;  %693 = vmatpush1.bf16.msra.mxu1 %v983_v61 }
  0x2d   : > { %653 = vmatprep.subr.bf16.mxu0 %v966_v62  ;;  %694 = vmatprep.subr.bf16.mxu1 %v968_v63 }
  0x2e   : > { %671 = vmatprep.mubr.bf16.mxu0 %v1078_v0  ;;  %712 = vmatprep.mubr.bf16.mxu1 %v1078_v0 }
  0x30   : > { %654 = vmatpush1.bf16.msra.mxu0 %v965_v1  ;;  %695 = vmatpush1.bf16.msra.mxu1 %v967_v2 }
  0x33   : > { %991 = vmatmul.mubr.msk.bf16.vlgmr.msra.gmra.mxu0 %vm389_vm0, %v1143_v27  ;;  %992 = vmatmul.mubr.msk.bf16.vlgmr.msra.gmra.mxu1 %vm389_vm0, %v1143_v27 }
  0xdb   : > { %v427_v3 = vpop.f32.mrf.mxu0  ;;  %v468_v4 = vpop.f32.mrf.mxu1 }
  0xdd   : > { %v429_v5 = vpop.f32.mrf.mxu0  ;;  %v470_v6 = vpop.f32.mrf.mxu1 }
  0xde   : > { %1022 = vtanh.f32 %v429_v5 }
  0xdf   : > { %1024 = vtanh.f32 %v470_v6  ;;  %v431_v7 = vpop.f32.mrf.mxu0  ;;  %v472_v8 = vpop.f32.mrf.mxu1 }
  0xe0   : > { %1026 = vtanh.f32 %v427_v3 }
  0xe1   : > { %1028 = vtanh.f32 %v468_v4  ;;  %v432_v9 = vpop.f32.mrf.mxu0  ;;  %v473_v0 = vpop.f32.mrf.mxu1 }
  0xe3   : > { %v509_v10 = vpop.f32.mrf.mxu0  ;;  %v550_v11 = vpop.f32.mrf.mxu1 }
  0xe4   : > { %1030 = vtanh.f32 %v509_v10 }
  0xe5   : > { %1032 = vtanh.f32 %v550_v11  ;;  %v511_v12 = vpop.f32.mrf.mxu0  ;;  %v552_v13 = vpop.f32.mrf.mxu1 }
  0xe6   : > { %1034 = vtanh.f32 %v511_v12 }
  0xe7   : > { %1036 = vtanh.f32 %v552_v13  ;;  %v513_v17 = vpop.f32.mrf.mxu0  ;;  %v554_v18 = vpop.f32.mrf.mxu1 }
  0xe9   : > { %v514_v19 = vpop.f32.mrf.mxu0  ;;  %v555_v20 = vpop.f32.mrf.mxu1 }
  0xeb   : > { %v1023_v21 = vpop.eup %1022  ;;  %v591_v24 = vpop.f32.mrf.mxu0 }
  0xec   : > { %v1025_v25 = vpop.eup %1024  ;;  %v632_v26 = vpop.f32.mrf.mxu1 }
  0xed   : > { %v1027_v27 = vpop.eup %1026  ;;  %v593_v28 = vpop.f32.mrf.mxu0 }
  0xee   : > { %v1029_v29 = vpop.eup %1028  ;;  %1038 = vtanh.f32 %v593_v28  ;;  %v634_v30 = vpop.f32.mrf.mxu1  ;;  %v753_v31 = vcombine.low %v1027_v27, %v1023_v21 }
  0xef   : > { %v754_v33 = vcombine.low %v1029_v29, %v1025_v25  ;;  %1040 = vtanh.f32 %v634_v30  ;;  %v595_v34 = vpop.f32.mrf.mxu0 }
  0xf0   : > { %1042 = vtanh.f32 %v591_v24  ;;  %v636_v35 = vpop.f32.mrf.mxu1  ;;  %v763_v41 = vrot.slane %v753_v31, %v762_v32 }
  0xf1   : > { %v1031_v36 = vpop.eup %1030  ;;  %1044 = vtanh.f32 %v632_v26  ;;  %v596_v37 = vpop.f32.mrf.mxu0  ;;  %v770_v42 = vrot.slane %v754_v33, %v762_v32 }
  0xf2   : > { %v1033_v38 = vpop.eup %1032  ;;  %v637_v39 = vpop.f32.mrf.mxu1 }
  0xf3   : > { %v1035_v40 = vpop.eup %1034  ;;  %v673_v43 = vpop.f32.mrf.mxu0  ;;  %v785_v51 = vcombine.low %v763_v41, %v770_v42 }
  0xf4   : > { %v1037_v44 = vpop.eup %1036  ;;  %v755_v45 = vcombine.low %v1031_v36, %v1035_v40  ;;  %1046 = vtanh.f32 %v673_v43  ;;  %v714_v46 = vpop.f32.mrf.mxu1 }
  0xf5   : > { %v756_v47 = vcombine.low %v1033_v38, %v1037_v44  ;;  %1048 = vtanh.f32 %v714_v46  ;;  %v675_v48 = vpop.f32.mrf.mxu0  ;;  %v793_v59 = vrot.slane %v785_v51, %v762_v32 }
  0xf6   : > { %v777_v49 = vrot.slane %v755_v45, %v762_v32  ;;  %1050 = vtanh.f32 %v675_v48  ;;  %v716_v50 = vpop.f32.mrf.mxu1 }
  0xf7   : > { %v784_v52 = vrot.slane %v756_v47, %v762_v32  ;;  %1052 = vtanh.f32 %v716_v50  ;;  %v677_v53 = vpop.f32.mrf.mxu0 }
  0xf8   : > { %v718_v54 = vpop.f32.mrf.mxu1 }
  0xf9   : > { %v786_v55 = vcombine.low %v777_v49, %v784_v52  ;;  %v678_v56 = vpop.f32.mrf.mxu0 }
  0xfa   : > { %v719_v57 = vpop.f32.mrf.mxu1 }
  0xfb   : > { %v1039_v58 = vpop.eup %1038  ;;  %v800_v60 = vrot.slane %v786_v55, %v762_v32 }
  0xfc   : > { %v1041_v61 = vpop.eup %1040 }
  0xfd   : > { %v1043_v62 = vpop.eup %1042  ;;  %v801_v63 = vcombine.low %v793_v59, %v800_v60 }
  0xfe   : > { %v1045_v1 = vpop.eup %1044  ;;  %v802_v2 = vcombine.low %v1043_v62, %v1039_v58 }
  0xff   : > { %853 = vst [vmem:[%s193_s23] sm:$0xff] %v801_v63  ;;  %v803_v3 = vcombine.low %v1045_v1, %v1041_v61 }
 0x100   : > { %v812_v7 = vrot.slane %v802_v2, %v762_v32 }
 0x101   : > { %v1047_v4 = vpop.eup %1046  ;;  %v819_v8 = vrot.slane %v803_v3, %v762_v32 }
 0x102   : > { %v1049_v5 = vpop.eup %1048 }
 0x103   : > { %v1051_v6 = vpop.eup %1050  ;;  %v834_v12 = vcombine.low %v812_v7, %v819_v8 }
 0x104   : > { %v1053_v9 = vpop.eup %1052  ;;  %v804_v0 = vcombine.low %v1047_v4, %v1051_v6 }
 0x105   : > { %v805_v10 = vcombine.low %v1049_v5, %v1053_v9  ;;  %v842_v15 = vrot.slane %v834_v12, %v762_v32 }
 0x106   : > { %v826_v11 = vrot.slane %v804_v0, %v762_v32 }
 0x107   : > { %v833_v13 = vrot.slane %v805_v10, %v762_v32 }
 0x109   : > { %v835_v14 = vcombine.low %v826_v11, %v833_v13 }
 0x10b   : > { %v849_v16 = vrot.slane %v835_v14, %v762_v32 }
 0x10d   : > { %v850_v17 = vcombine.low %v842_v15, %v849_v16 }
 0x10f   : > { %854 = vst [vmem:[%s193_s23 + $0x8] sm:$0xff] %v850_v17 }
 0x110 PF: > { %s12_s11 = sadd.s32 1, %s1076_s11   ;;  %s1199_s9 = smov %s1072_s10 }
 0x111   : > { %p9_p5 = scmp.ge.s32.totalorder %s12_s11, 6   ;;  %s1200_s10 = smov %s1202_s12 }
 0x113   :  { %11 = sbr.rel (!%p9_p5) target bundleno = 2 (0x2), region = 61 }

</bundles_post_ra>
